<compile_context>
chip_gen: v6e
topology: v6e:2x2x1
jax: 0.10.0
libtpu: 0.0.40
codegen_flags: <defaults>
</compile_context>

<pallas_src>
import functools

import jax
import jax.numpy as jnp
from jax.experimental import pallas as pl
from jax.experimental.pallas import tpu as pltpu


# ----------------------------------------------------------------------------
# Pallas kernel: tiled fused batched matmul  out[p] = act(A[p] @ B[p] + bias)
#   - f32 inputs, f32 accumulation in VMEM scratch
#   - grid = (P, Mt, Nt, Kt); k-reduction: init at k==0, bias+act+store at last
# ----------------------------------------------------------------------------
def _fused_mm_kernel(a_ref, b_ref, bias_ref, o_ref, acc_ref, *, act):
    @pl.when(pl.program_id(3) == 0)
    def _():
        acc_ref[...] = jnp.zeros_like(acc_ref)

    acc_ref[...] += jnp.dot(a_ref[...], b_ref[...],
                            preferred_element_type=jnp.float32)

    @pl.when(pl.program_id(3) == pl.num_programs(3) - 1)
    def _():
        y = acc_ref[...] + bias_ref[...]
        if act == "leaky_relu":
            y = jnp.where(y > 0, y, 0.2 * y)
        elif act == "sigmoid":
            y = jax.nn.sigmoid(y)
        # act == "none": identity
        o_ref[...] = y.astype(o_ref.dtype)


def _fit(dim, base, cap):
    """Pad `dim` and pick a tile so (padded % tile == 0) and tile <= cap."""
    p = -(-dim // base) * base
    if p <= cap:
        return p, p
    p = -(-dim // cap) * cap
    return p, cap


# Tile caps: f32 A(256x512) + f32 B(512x512) + f32 acc/out(256x512), double
# buffered, stays well under the default 32 MiB scoped VMEM on every chip.
_TM, _TN, _TK = 256, 512, 512


def fused_matmul(a, b, bias, act, bias_mode):
    """out = act(a @ b + bias).
    a: (M,K) or (P,M,K); b: (K,N) or (P,K,N).
    bias_mode == "row": bias:(M,) broadcast over columns (per-output-channel).
    bias_mode == "col": bias:(N,) broadcast over rows."""
    squeeze = a.ndim == 2
    if squeeze:
        a, b = a[None], b[None]
    P, M, K = a.shape
    P2, K2, N = b.shape
    assert P == P2 and K == K2

    Mp, tm = _fit(M, 8, _TM)
    Np, tn = _fit(N, 128, _TN)
    Kp, tk = _fit(K, 128, _TK)

    a_p = jnp.pad(a.astype(jnp.float32), ((0, 0), (0, Mp - M), (0, Kp - K)))
    b_p = jnp.pad(b.astype(jnp.float32), ((0, 0), (0, Kp - K), (0, Np - N)))

    if bias_mode == "col":
        bias_p = jnp.pad(bias.reshape(1, N).astype(jnp.float32),
                         ((0, 0), (0, Np - N)))
        bias_spec = pl.BlockSpec((1, tn), lambda p, i, j, k: (0, j))
    else:  # "row"
        bias_p = jnp.pad(bias.reshape(M, 1).astype(jnp.float32),
                         ((0, Mp - M), (0, 0)))
        bias_spec = pl.BlockSpec((tm, 1), lambda p, i, j, k: (i, 0))

    grid = (P, Mp // tm, Np // tn, Kp // tk)

    out = pl.pallas_call(
        functools.partial(_fused_mm_kernel, act=act),
        out_shape=jax.ShapeDtypeStruct((P, Mp, Np), jnp.float32),
        grid=grid,
        in_specs=[
            pl.BlockSpec((None, tm, tk), lambda p, i, j, k: (p, i, k)),
            pl.BlockSpec((None, tk, tn), lambda p, i, j, k: (p, k, j)),
            bias_spec,
        ],
        out_specs=pl.BlockSpec((None, tm, tn), lambda p, i, j, k: (p, i, j)),
        scratch_shapes=[pltpu.VMEM((tm, tn), jnp.float32)],
        compiler_params=pltpu.CompilerParams(
            dimension_semantics=("parallel", "parallel", "parallel",
                                 "arbitrary"),
            vmem_limit_bytes=32 * 1024 * 1024,
        ),
    )(a_p, b_p, bias_p)
    out = out[:, :M, :N]
    return out[0] if squeeze else out


# ----------------------------------------------------------------------------
# Glue helpers (BN fold, phase gather, nearest interpolation) -- plain JAX
# ----------------------------------------------------------------------------
def _bn_fold(bn, eps=1e-5):
    gamma, beta, mean, var = bn
    scale = gamma / jnp.sqrt(var + eps)
    bias = beta - mean * scale
    return scale, bias


def conv_transpose3d_bn_lrelu(x, w_t, bn):
    """x: (Cin, B, D, H, W).  w_t: PyTorch ConvTranspose3d weight
    (Cin, Cout, 4, 4, 4), stride=2, padding=1, bias=False.
    Returns LeakyReLU(BN(conv_transpose(x))) as (Cout, B, 2D, 2H, 2W).

    Decomposed into the 8 output phases (od%2, oh%2, ow%2); each phase is an
    effective 2x2x2 stride-1 conv -> lane-dense matmul (Cout, 8*Cin)x(8*Cin, S).
    All 8 phases run inside a single batched pallas_call.
    """
    Cin, B, D, H, W = x.shape
    Cout = w_t.shape[1]
    S = B * D * H * W
    scale, bias = _bn_fold(bn)

    # pad every spatial dim by 1 on both sides (zero contributions at borders)
    xp = jnp.pad(x, ((0, 0), (0, 0), (1, 1), (1, 1), (1, 1)))

    pats, wms = [], []
    for rd in (0, 1):
        for rh in (0, 1):
            for rw in (0, 1):
                slabs, wrows = [], []
                # offsets o in {r, r+1}; kernel tap k = 3 - 2*o + r
                for od in (rd, rd + 1):
                    kd = 3 - 2 * od + rd
                    for oh in (rh, rh + 1):
                        kh = 3 - 2 * oh + rh
                        for ow in (rw, rw + 1):
                            kw = 3 - 2 * ow + rw
                            slabs.append(xp[:, :, od:od + D, oh:oh + H, ow:ow + W])
                            wrows.append(w_t[:, :, kd, kh, kw])  # (Cin, Cout)
                # patches: (8, Cin, B, D, H, W) -> (8*Cin, S)  (spatial on lanes)
                pats.append(jnp.stack(slabs, 0).reshape(8 * Cin, S))
                # weights: (8, Cin, Cout) -> (8*Cin, Cout); fold BN; transpose
                wm = jnp.stack(wrows, 0).reshape(8 * Cin, Cout).astype(jnp.float32)
                wms.append((wm * scale[None, :]).T)               # (Cout, 8*Cin)

    pat_all = jnp.stack(pats, 0)   # (8, 8*Cin, S)
    w_all = jnp.stack(wms, 0)      # (8, Cout, 8*Cin)
    y = fused_matmul(w_all, pat_all, bias, "leaky_relu", bias_mode="row")

    ys = y.reshape(2, 2, 2, Cout, B, D, H, W)
    out = jnp.transpose(ys, (3, 4, 5, 0, 6, 1, 7, 2))
    return out.reshape(Cout, B, 2 * D, 2 * H, 2 * W)


def conv1x1x1(x, w, bn, act):
    """x: (Cin, B, D, H, W).  w: PyTorch Conv3d weight (Cout, Cin, 1, 1, 1)."""
    Cin, B, D, H, W = x.shape
    Cout = w.shape[0]
    wm = w.reshape(Cout, Cin).astype(jnp.float32)
    if bn is not None:
        scale, bias = _bn_fold(bn)
        wm = wm * scale[:, None]
    else:
        bias = jnp.zeros((Cout,), jnp.float32)
    out = fused_matmul(wm, x.reshape(Cin, B * D * H * W), bias, act,
                       bias_mode="row")
    return out.reshape(Cout, B, D, H, W)


def nearest3d(xh, t):
    """F.interpolate(mode='nearest') to (t,t,t).  xh: (C, B, S, S, S)."""
    _, _, Sd, Sh, Sw = xh.shape

    def idx(S, T):
        return jnp.floor(jnp.arange(T) * (S / T)).astype(jnp.int32)

    y = jnp.take(xh, idx(Sd, t), axis=2)
    y = jnp.take(y, idx(Sh, t), axis=3)
    y = jnp.take(y, idx(Sw, t), axis=4)
    return y


# ----------------------------------------------------------------------------
# Decoder forward
# ----------------------------------------------------------------------------
def decoder_forward(params, x, x_human_ncdhw, *, in_channels, out_dim):
    in_dim = out_dim // 16
    B = x.shape[0]

    # Linear (lane-dense: N = in_channels*in_dim^3); lin_wt pre-transposed.
    y = fused_matmul(x, params["lin_wt"], params["lin_b"], "none",
                     bias_mode="col")
    # project to starting volume; internal layout (C, B, D, H, W)
    v = y.reshape(B, in_channels, in_dim, in_dim, in_dim).transpose(1, 0, 2, 3, 4)

    xh = jnp.transpose(x_human_ncdhw, (1, 0, 2, 3, 4))  # (1, B, Dh, Hh, Wh)

    v = conv_transpose3d_bn_lrelu(v, params["w1"], params["bn1"])
    v = jnp.concatenate([v, nearest3d(xh, out_dim // 8)], axis=0)
    v = conv_transpose3d_bn_lrelu(v, params["w2"], params["bn2"])
    v = jnp.concatenate([v, nearest3d(xh, out_dim // 4)], axis=0)
    v = conv_transpose3d_bn_lrelu(v, params["w3"], params["bn3"])
    v = jnp.concatenate([v, nearest3d(xh, out_dim // 2)], axis=0)
    v = conv_transpose3d_bn_lrelu(v, params["w4"], params["bn4"])
    v = jnp.concatenate([v, nearest3d(xh, out_dim)], axis=0)
    v = conv1x1x1(v, params["wo1"], params["bn5"], "leaky_relu")
    v = conv1x1x1(v, params["wo2"], None, "sigmoid")
    return jnp.transpose(v, (1, 0, 2, 3, 4))  # back to NCDHW


# ----------------------------------------------------------------------------
# Deterministic parameter construction
# ----------------------------------------------------------------------------
def make_params(key, in_channels, out_dim, out_channels, input_len):
    in_dim = out_dim // 16
    c1 = in_channels // 2
    c2 = c1 // 2
    c3 = c2 // 2
    c4 = c3 // 2
    ks = jax.random.split(key, 16)

    def bn(k, c):
        k1, k2, k3, k4 = jax.random.split(k, 4)
        gamma = 1.0 + 0.1 * jax.random.normal(k1, (c,), jnp.float32)
        beta = 0.1 * jax.random.normal(k2, (c,), jnp.float32)
        mean = 0.1 * jax.random.normal(k3, (c,), jnp.float32)
        var = jax.random.uniform(k4, (c,), jnp.float32, 0.5, 1.5)
        return (gamma, beta, mean, var)

    nfeat = in_channels * in_dim ** 3
    params = {
        # stored pre-transposed as (input_len, nfeat) -> no trace-time transpose
        "lin_wt": 0.1 * jax.random.normal(ks[0], (input_len, nfeat), jnp.float32),
        "lin_b": 0.1 * jax.random.normal(ks[1], (nfeat,), jnp.float32),
        "w1": 0.1 * jax.random.normal(ks[2], (in_channels, c1, 4, 4, 4), jnp.float32),
        "bn1": bn(ks[3], c1),
        "w2": 0.1 * jax.random.normal(ks[4], (c1 + 1, c2, 4, 4, 4), jnp.float32),
        "bn2": bn(ks[5], c2),
        "w3": 0.1 * jax.random.normal(ks[6], (c2 + 1, c3, 4, 4, 4), jnp.float32),
        "bn3": bn(ks[7], c3),
        "w4": 0.1 * jax.random.normal(ks[8], (c3 + 1, c4, 4, 4, 4), jnp.float32),
        "bn4": bn(ks[9], c4),
        "wo1": 0.1 * jax.random.normal(ks[10], (c4, c4 + 1, 1, 1, 1), jnp.float32),
        "bn5": bn(ks[11], c4),
        "wo2": 0.1 * jax.random.normal(ks[12], (out_channels, c4, 1, 1, 1), jnp.float32),
    }
    return params


# ----------------------------------------------------------------------------
if __name__ == "__main__":
    # Small-but-consistent configuration:
    #   in_channels=16, out_dim=16 -> in_dim=1, input_len=8, out_channels=1
    IN_CH, OUT_DIM, OUT_CH, IN_LEN, B = 16, 16, 1, 8, 2

    key = jax.random.PRNGKey(0)
    kp, kx, kh = jax.random.split(key, 3)
    params = make_params(kp, IN_CH, OUT_DIM, OUT_CH, IN_LEN)

    x = jax.random.normal(kx, (B, IN_LEN), jnp.float32)            # latent vector
    x_human = jax.random.normal(kh, (B, 1, 6, 6, 6), jnp.float32)  # NCDHW, 1 channel

    fwd = jax.jit(functools.partial(decoder_forward,
                                    in_channels=IN_CH, out_dim=OUT_DIM))
    out = jax.block_until_ready(fwd(params, x, x_human))

    assert out.shape == (B, OUT_CH, OUT_DIM, OUT_DIM, OUT_DIM), out.shape
    assert bool(jnp.all(jnp.isfinite(out)))
    assert bool(jnp.all((out >= 0.0) & (out <= 1.0)))  # sigmoid output range
    print("KERNEL_OK")
</pallas_src>

<mosaic_0001>
module attributes {stable_mosaic.version = 11 : i64} {
  func.func @_fused_mm_kernel(%arg0: i32, %arg1: i32, %arg2: i32, %arg3: i32, %arg4: memref<1x8x128xf32, #tpu.memory_space<vmem>>, %arg5: memref<1x128x128xf32, #tpu.memory_space<vmem>>, %arg6: memref<1x128xf32, #tpu.memory_space<vmem>>, %arg7: memref<1x8x128xf32, #tpu.memory_space<vmem>>, %arg8: memref<8x128xf32, #tpu.memory_space<vmem>>) attributes {dimension_semantics = [#tpu.dimension_semantics<parallel>, #tpu.dimension_semantics<parallel>, #tpu.dimension_semantics<parallel>, #tpu.dimension_semantics<arbitrary>], iteration_bounds = array<i64: 1, 1, 1, 1>, scalar_prefetch = 0 : i64, scratch_operands = 1 : i64, tpu.core_type = #tpu.core_type<tc>, window_params = [{transform_indices = @transform_0, window_bounds = array<i64: 1, 8, 128>}, {transform_indices = @transform_1, window_bounds = array<i64: 1, 128, 128>}, {transform_indices = @transform_2, window_bounds = array<i64: 1, 128>}, {transform_indices = @transform_3, window_bounds = array<i64: 1, 8, 128>}]} {
    %c0_i32 = arith.constant 0 : i32
    %0 = arith.cmpi eq, %arg3, %c0_i32 : i32
    %1 = arith.extui %0 : i1 to i32
    %c0_i32_0 = arith.constant 0 : i32
    %2 = arith.cmpi ne, %1, %c0_i32_0 : i32
    scf.if %2 {
      %cst_12 = arith.constant 0.000000e+00 : f32
      %14 = vector.broadcast %cst_12 : f32 to vector<8x128xf32>
      %c0_13 = arith.constant 0 : index
      %c0_14 = arith.constant 0 : index
      %15 = vector.load %arg8[%c0_13, %c0_14] : memref<8x128xf32, #tpu.memory_space<vmem>>, vector<8x128xf32>
      tpu.vector_store %arg8[%c0_13, %c0_14], %14 {strides = array<i32>} : memref<8x128xf32, #tpu.memory_space<vmem>>, vector<8x128xf32>,
    } else {
    }
    %c0 = arith.constant 0 : index
    %c0_1 = arith.constant 0 : index
    %3 = vector.load %arg8[%c0, %c0_1] : memref<8x128xf32, #tpu.memory_space<vmem>>, vector<8x128xf32>
    %c0_2 = arith.constant 0 : index
    %c0_3 = arith.constant 0 : index
    %c0_4 = arith.constant 0 : index
    %4 = vector.load %arg4[%c0_2, %c0_3, %c0_4] : memref<1x8x128xf32, #tpu.memory_space<vmem>>, vector<1x8x128xf32>
    %5 = vector.shape_cast %4 : vector<1x8x128xf32> to vector<8x128xf32>
    %c0_5 = arith.constant 0 : index
    %c0_6 = arith.constant 0 : index
    %c0_7 = arith.constant 0 : index
    %6 = vector.load %arg5[%c0_5, %c0_6, %c0_7] : memref<1x128x128xf32, #tpu.memory_space<vmem>>, vector<1x128x128xf32>
    %7 = vector.shape_cast %6 : vector<1x128x128xf32> to vector<128x128xf32>
    %cst = arith.constant dense<0.000000e+00> : vector<8x128xf32>
    %8 = tpu.matmul %5, %7, %cst {dimension_numbers = #tpu.dot_dimension_numbers<[1], [0], [0], [1], [0, 0, 1, 1], [], []>} : vector<8x128xf32>, vector<128x128xf32>, vector<8x128xf32> -> vector<8x128xf32>
    %9 = arith.addf %3, %8 : vector<8x128xf32>
    %c0_8 = arith.constant 0 : index
    %c0_9 = arith.constant 0 : index
    %10 = vector.load %arg8[%c0_8, %c0_9] : memref<8x128xf32, #tpu.memory_space<vmem>>, vector<8x128xf32>
    tpu.vector_store %arg8[%c0_8, %c0_9], %9 {strides = array<i32>} : memref<8x128xf32, #tpu.memory_space<vmem>>, vector<8x128xf32>,
    %c0_i32_10 = arith.constant 0 : i32
    %11 = arith.cmpi eq, %arg3, %c0_i32_10 : i32
    %12 = arith.extui %11 : i1 to i32
    %c0_i32_11 = arith.constant 0 : i32
    %13 = arith.cmpi ne, %12, %c0_i32_11 : i32
    scf.if %13 {
      %c0_12 = arith.constant 0 : index
      %c0_13 = arith.constant 0 : index
      %14 = vector.load %arg8[%c0_12, %c0_13] : memref<8x128xf32, #tpu.memory_space<vmem>>, vector<8x128xf32>
      %c0_14 = arith.constant 0 : index
      %c0_15 = arith.constant 0 : index
      %15 = vector.load %arg6[%c0_14, %c0_15] : memref<1x128xf32, #tpu.memory_space<vmem>>, vector<1x128xf32>
      %16 = vector.broadcast %15 : vector<1x128xf32> to vector<8x128xf32>
      %17 = arith.addf %14, %16 : vector<8x128xf32>
      %c0_16 = arith.constant 0 : index
      %c0_17 = arith.constant 0 : index
      %c0_18 = arith.constant 0 : index
      %18 = vector.load %arg7[%c0_16, %c0_17, %c0_18] : memref<1x8x128xf32, #tpu.memory_space<vmem>>, vector<1x8x128xf32>
      %19 = vector.shape_cast %18 : vector<1x8x128xf32> to vector<8x128xf32>
      %20 = vector.shape_cast %17 : vector<8x128xf32> to vector<1x8x128xf32>
      tpu.vector_store %arg7[%c0_16, %c0_17, %c0_18], %20 {strides = array<i32>} : memref<1x8x128xf32, #tpu.memory_space<vmem>>, vector<1x8x128xf32>,
    } else {
    }
    return
  }
  func.func @transform_0(%arg0: i32, %arg1: i32, %arg2: i32, %arg3: i32) -> (i32, i32, i32) {
    %c0_i32 = arith.constant 0 : i32
    return %arg0, %arg1, %arg3 : i32, i32, i32
  }
  func.func @transform_1(%arg0: i32, %arg1: i32, %arg2: i32, %arg3: i32) -> (i32, i32, i32) {
    %c0_i32 = arith.constant 0 : i32
    return %arg0, %arg3, %arg2 : i32, i32, i32
  }
  func.func @transform_2(%arg0: i32, %arg1: i32, %arg2: i32, %arg3: i32) -> (i32, i32) {
    %c0_i32 = arith.constant 0 : i32
    %c0_i32_0 = arith.constant 0 : i32
    return %c0_i32, %arg2 : i32, i32
  }
  func.func @transform_3(%arg0: i32, %arg1: i32, %arg2: i32, %arg3: i32) -> (i32, i32, i32) {
    %c0_i32 = arith.constant 0 : i32
    return %arg0, %arg1, %arg2 : i32, i32, i32
  }
}

module attributes {stable_mosaic.version = 11 : i64} {
  func.func @_fused_mm_kernel(%arg0: i32, %arg1: i32, %arg2: i32, %arg3: i32, %arg4: memref<1x8x128xf32, #tpu.memory_space<vmem>>, %arg5: memref<1x128x128xf32, #tpu.memory_space<vmem>>, %arg6: memref<8x1xf32, #tpu.memory_space<vmem>>, %arg7: memref<1x8x128xf32, #tpu.memory_space<vmem>>, %arg8: memref<8x128xf32, #tpu.memory_space<vmem>>) attributes {dimension_semantics = [#tpu.dimension_semantics<parallel>, #tpu.dimension_semantics<parallel>, #tpu.dimension_semantics<parallel>, #tpu.dimension_semantics<arbitrary>], iteration_bounds = array<i64: 8, 1, 1, 1>, scalar_prefetch = 0 : i64, scratch_operands = 1 : i64, tpu.core_type = #tpu.core_type<tc>, window_params = [{transform_indices = @transform_0, window_bounds = array<i64: 1, 8, 128>}, {transform_indices = @transform_1, window_bounds = array<i64: 1, 128, 128>}, {transform_indices = @transform_2, window_bounds = array<i64: 8, 1>}, {transform_indices = @transform_3, window_bounds = array<i64: 1, 8, 128>}]} {
    %c0_i32 = arith.constant 0 : i32
    %0 = arith.cmpi eq, %arg3, %c0_i32 : i32
    %1 = arith.extui %0 : i1 to i32
    %c0_i32_0 = arith.constant 0 : i32
    %2 = arith.cmpi ne, %1, %c0_i32_0 : i32
    scf.if %2 {
      %cst_12 = arith.constant 0.000000e+00 : f32
      %14 = vector.broadcast %cst_12 : f32 to vector<8x128xf32>
      %c0_13 = arith.constant 0 : index
      %c0_14 = arith.constant 0 : index
      %15 = vector.load %arg8[%c0_13, %c0_14] : memref<8x128xf32, #tpu.memory_space<vmem>>, vector<8x128xf32>
      tpu.vector_store %arg8[%c0_13, %c0_14], %14 {strides = array<i32>} : memref<8x128xf32, #tpu.memory_space<vmem>>, vector<8x128xf32>,
    } else {
    }
    %c0 = arith.constant 0 : index
    %c0_1 = arith.constant 0 : index
    %3 = vector.load %arg8[%c0, %c0_1] : memref<8x128xf32, #tpu.memory_space<vmem>>, vector<8x128xf32>
    %c0_2 = arith.constant 0 : index
    %c0_3 = arith.constant 0 : index
    %c0_4 = arith.constant 0 : index
    %4 = vector.load %arg4[%c0_2, %c0_3, %c0_4] : memref<1x8x128xf32, #tpu.memory_space<vmem>>, vector<1x8x128xf32>
    %5 = vector.shape_cast %4 : vector<1x8x128xf32> to vector<8x128xf32>
    %c0_5 = arith.constant 0 : index
    %c0_6 = arith.constant 0 : index
    %c0_7 = arith.constant 0 : index
    %6 = vector.load %arg5[%c0_5, %c0_6, %c0_7] : memref<1x128x128xf32, #tpu.memory_space<vmem>>, vector<1x128x128xf32>
    %7 = vector.shape_cast %6 : vector<1x128x128xf32> to vector<128x128xf32>
    %cst = arith.constant dense<0.000000e+00> : vector<8x128xf32>
    %8 = tpu.matmul %5, %7, %cst {dimension_numbers = #tpu.dot_dimension_numbers<[1], [0], [0], [1], [0, 0, 1, 1], [], []>} : vector<8x128xf32>, vector<128x128xf32>, vector<8x128xf32> -> vector<8x128xf32>
    %9 = arith.addf %3, %8 : vector<8x128xf32>
    %c0_8 = arith.constant 0 : index
    %c0_9 = arith.constant 0 : index
    %10 = vector.load %arg8[%c0_8, %c0_9] : memref<8x128xf32, #tpu.memory_space<vmem>>, vector<8x128xf32>
    tpu.vector_store %arg8[%c0_8, %c0_9], %9 {strides = array<i32>} : memref<8x128xf32, #tpu.memory_space<vmem>>, vector<8x128xf32>,
    %c0_i32_10 = arith.constant 0 : i32
    %11 = arith.cmpi eq, %arg3, %c0_i32_10 : i32
    %12 = arith.extui %11 : i1 to i32
    %c0_i32_11 = arith.constant 0 : i32
    %13 = arith.cmpi ne, %12, %c0_i32_11 : i32
    scf.if %13 {
      %c0_12 = arith.constant 0 : index
      %c0_13 = arith.constant 0 : index
      %14 = vector.load %arg8[%c0_12, %c0_13] : memref<8x128xf32, #tpu.memory_space<vmem>>, vector<8x128xf32>
      %c0_14 = arith.constant 0 : index
      %c0_15 = arith.constant 0 : index
      %15 = vector.load %arg6[%c0_14, %c0_15] : memref<8x1xf32, #tpu.memory_space<vmem>>, vector<8x1xf32>
      %16 = vector.broadcast %15 : vector<8x1xf32> to vector<8x128xf32>
      %17 = arith.addf %14, %16 : vector<8x128xf32>
      %cst_16 = arith.constant 0.000000e+00 : f32
      %18 = vector.broadcast %cst_16 : f32 to vector<8x128xf32>
      %19 = arith.cmpf ogt, %17, %18 : vector<8x128xf32>
      %cst_17 = arith.constant 2.000000e-01 : f32
      %20 = vector.broadcast %cst_17 : f32 to vector<8x128xf32>
      %21 = arith.mulf %20, %17 : vector<8x128xf32>
      %22 = arith.select %19, %17, %21 : vector<8x128xi1>, vector<8x128xf32>
      %c0_18 = arith.constant 0 : index
      %c0_19 = arith.constant 0 : index
      %c0_20 = arith.constant 0 : index
      %23 = vector.load %arg7[%c0_18, %c0_19, %c0_20] : memref<1x8x128xf32, #tpu.memory_space<vmem>>, vector<1x8x128xf32>
      %24 = vector.shape_cast %23 : vector<1x8x128xf32> to vector<8x128xf32>
      %25 = vector.shape_cast %22 : vector<8x128xf32> to vector<1x8x128xf32>
      tpu.vector_store %arg7[%c0_18, %c0_19, %c0_20], %25 {strides = array<i32>} : memref<1x8x128xf32, #tpu.memory_space<vmem>>, vector<1x8x128xf32>,
    } else {
    }
    return
  }
  func.func @transform_0(%arg0: i32, %arg1: i32, %arg2: i32, %arg3: i32) -> (i32, i32, i32) {
    %c0_i32 = arith.constant 0 : i32
    return %arg0, %arg1, %arg3 : i32, i32, i32
  }
  func.func @transform_1(%arg0: i32, %arg1: i32, %arg2: i32, %arg3: i32) -> (i32, i32, i32) {
    %c0_i32 = arith.constant 0 : i32
    return %arg0, %arg3, %arg2 : i32, i32, i32
  }
  func.func @transform_2(%arg0: i32, %arg1: i32, %arg2: i32, %arg3: i32) -> (i32, i32) {
    %c0_i32 = arith.constant 0 : i32
    %c0_i32_0 = arith.constant 0 : i32
    return %arg1, %c0_i32 : i32, i32
  }
  func.func @transform_3(%arg0: i32, %arg1: i32, %arg2: i32, %arg3: i32) -> (i32, i32, i32) {
    %c0_i32 = arith.constant 0 : i32
    return %arg0, %arg1, %arg2 : i32, i32, i32
  }
}

module attributes {stable_mosaic.version = 11 : i64} {
  func.func @_fused_mm_kernel(%arg0: i32, %arg1: i32, %arg2: i32, %arg3: i32, %arg4: memref<1x8x128xf32, #tpu.memory_space<vmem>>, %arg5: memref<1x128x512xf32, #tpu.memory_space<vmem>>, %arg6: memref<8x1xf32, #tpu.memory_space<vmem>>, %arg7: memref<1x8x512xf32, #tpu.memory_space<vmem>>, %arg8: memref<8x512xf32, #tpu.memory_space<vmem>>) attributes {dimension_semantics = [#tpu.dimension_semantics<parallel>, #tpu.dimension_semantics<parallel>, #tpu.dimension_semantics<parallel>, #tpu.dimension_semantics<arbitrary>], iteration_bounds = array<i64: 8, 1, 2, 1>, scalar_prefetch = 0 : i64, scratch_operands = 1 : i64, tpu.core_type = #tpu.core_type<tc>, window_params = [{transform_indices = @transform_0, window_bounds = array<i64: 1, 8, 128>}, {transform_indices = @transform_1, window_bounds = array<i64: 1, 128, 512>}, {transform_indices = @transform_2, window_bounds = array<i64: 8, 1>}, {transform_indices = @transform_3, window_bounds = array<i64: 1, 8, 512>}]} {
    %c0_i32 = arith.constant 0 : i32
    %0 = arith.cmpi eq, %arg3, %c0_i32 : i32
    %1 = arith.extui %0 : i1 to i32
    %c0_i32_0 = arith.constant 0 : i32
    %2 = arith.cmpi ne, %1, %c0_i32_0 : i32
    scf.if %2 {
      %cst_12 = arith.constant 0.000000e+00 : f32
      %14 = vector.broadcast %cst_12 : f32 to vector<8x512xf32>
      %c0_13 = arith.constant 0 : index
      %c0_14 = arith.constant 0 : index
      %15 = vector.load %arg8[%c0_13, %c0_14] : memref<8x512xf32, #tpu.memory_space<vmem>>, vector<8x512xf32>
      tpu.vector_store %arg8[%c0_13, %c0_14], %14 {strides = array<i32>} : memref<8x512xf32, #tpu.memory_space<vmem>>, vector<8x512xf32>,
    } else {
    }
    %c0 = arith.constant 0 : index
    %c0_1 = arith.constant 0 : index
    %3 = vector.load %arg8[%c0, %c0_1] : memref<8x512xf32, #tpu.memory_space<vmem>>, vector<8x512xf32>
    %c0_2 = arith.constant 0 : index
    %c0_3 = arith.constant 0 : index
    %c0_4 = arith.constant 0 : index
    %4 = vector.load %arg4[%c0_2, %c0_3, %c0_4] : memref<1x8x128xf32, #tpu.memory_space<vmem>>, vector<1x8x128xf32>
    %5 = vector.shape_cast %4 : vector<1x8x128xf32> to vector<8x128xf32>
    %c0_5 = arith.constant 0 : index
    %c0_6 = arith.constant 0 : index
    %c0_7 = arith.constant 0 : index
    %6 = vector.load %arg5[%c0_5, %c0_6, %c0_7] : memref<1x128x512xf32, #tpu.memory_space<vmem>>, vector<1x128x512xf32>
    %7 = vector.shape_cast %6 : vector<1x128x512xf32> to vector<128x512xf32>
    %cst = arith.constant dense<0.000000e+00> : vector<8x512xf32>
    %8 = tpu.matmul %5, %7, %cst {dimension_numbers = #tpu.dot_dimension_numbers<[1], [0], [0], [1], [0, 0, 1, 1], [], []>} : vector<8x128xf32>, vector<128x512xf32>, vector<8x512xf32> -> vector<8x512xf32>
    %9 = arith.addf %3, %8 : vector<8x512xf32>
    %c0_8 = arith.constant 0 : index
    %c0_9 = arith.constant 0 : index
    %10 = vector.load %arg8[%c0_8, %c0_9] : memref<8x512xf32, #tpu.memory_space<vmem>>, vector<8x512xf32>
    tpu.vector_store %arg8[%c0_8, %c0_9], %9 {strides = array<i32>} : memref<8x512xf32, #tpu.memory_space<vmem>>, vector<8x512xf32>,
    %c0_i32_10 = arith.constant 0 : i32
    %11 = arith.cmpi eq, %arg3, %c0_i32_10 : i32
    %12 = arith.extui %11 : i1 to i32
    %c0_i32_11 = arith.constant 0 : i32
    %13 = arith.cmpi ne, %12, %c0_i32_11 : i32
    scf.if %13 {
      %c0_12 = arith.constant 0 : index
      %c0_13 = arith.constant 0 : index
      %14 = vector.load %arg8[%c0_12, %c0_13] : memref<8x512xf32, #tpu.memory_space<vmem>>, vector<8x512xf32>
      %c0_14 = arith.constant 0 : index
      %c0_15 = arith.constant 0 : index
      %15 = vector.load %arg6[%c0_14, %c0_15] : memref<8x1xf32, #tpu.memory_space<vmem>>, vector<8x1xf32>
      %16 = vector.broadcast %15 : vector<8x1xf32> to vector<8x512xf32>
      %17 = arith.addf %14, %16 : vector<8x512xf32>
      %cst_16 = arith.constant 0.000000e+00 : f32
      %18 = vector.broadcast %cst_16 : f32 to vector<8x512xf32>
      %19 = arith.cmpf ogt, %17, %18 : vector<8x512xf32>
      %cst_17 = arith.constant 2.000000e-01 : f32
      %20 = vector.broadcast %cst_17 : f32 to vector<8x512xf32>
      %21 = arith.mulf %20, %17 : vector<8x512xf32>
      %22 = arith.select %19, %17, %21 : vector<8x512xi1>, vector<8x512xf32>
      %c0_18 = arith.constant 0 : index
      %c0_19 = arith.constant 0 : index
      %c0_20 = arith.constant 0 : index
      %23 = vector.load %arg7[%c0_18, %c0_19, %c0_20] : memref<1x8x512xf32, #tpu.memory_space<vmem>>, vector<1x8x512xf32>
      %24 = vector.shape_cast %23 : vector<1x8x512xf32> to vector<8x512xf32>
      %25 = vector.shape_cast %22 : vector<8x512xf32> to vector<1x8x512xf32>
      tpu.vector_store %arg7[%c0_18, %c0_19, %c0_20], %25 {strides = array<i32>} : memref<1x8x512xf32, #tpu.memory_space<vmem>>, vector<1x8x512xf32>,
    } else {
    }
    return
  }
  func.func @transform_0(%arg0: i32, %arg1: i32, %arg2: i32, %arg3: i32) -> (i32, i32, i32) {
    %c0_i32 = arith.constant 0 : i32
    return %arg0, %arg1, %arg3 : i32, i32, i32
  }
  func.func @transform_1(%arg0: i32, %arg1: i32, %arg2: i32, %arg3: i32) -> (i32, i32, i32) {
    %c0_i32 = arith.constant 0 : i32
    return %arg0, %arg3, %arg2 : i32, i32, i32
  }
  func.func @transform_2(%arg0: i32, %arg1: i32, %arg2: i32, %arg3: i32) -> (i32, i32) {
    %c0_i32 = arith.constant 0 : i32
    %c0_i32_0 = arith.constant 0 : i32
    return %arg1, %c0_i32 : i32, i32
  }
  func.func @transform_3(%arg0: i32, %arg1: i32, %arg2: i32, %arg3: i32) -> (i32, i32, i32) {
    %c0_i32 = arith.constant 0 : i32
    return %arg0, %arg1, %arg2 : i32, i32, i32
  }
}

module attributes {stable_mosaic.version = 11 : i64} {
  func.func @_fused_mm_kernel(%arg0: i32, %arg1: i32, %arg2: i32, %arg3: i32, %arg4: memref<1x8x128xf32, #tpu.memory_space<vmem>>, %arg5: memref<1x128x512xf32, #tpu.memory_space<vmem>>, %arg6: memref<8x1xf32, #tpu.memory_space<vmem>>, %arg7: memref<1x8x512xf32, #tpu.memory_space<vmem>>, %arg8: memref<8x512xf32, #tpu.memory_space<vmem>>) attributes {dimension_semantics = [#tpu.dimension_semantics<parallel>, #tpu.dimension_semantics<parallel>, #tpu.dimension_semantics<parallel>, #tpu.dimension_semantics<arbitrary>], iteration_bounds = array<i64: 1, 1, 16, 1>, scalar_prefetch = 0 : i64, scratch_operands = 1 : i64, tpu.core_type = #tpu.core_type<tc>, window_params = [{transform_indices = @transform_0, window_bounds = array<i64: 1, 8, 128>}, {transform_indices = @transform_1, window_bounds = array<i64: 1, 128, 512>}, {transform_indices = @transform_2, window_bounds = array<i64: 8, 1>}, {transform_indices = @transform_3, window_bounds = array<i64: 1, 8, 512>}]} {
    %c0_i32 = arith.constant 0 : i32
    %0 = arith.cmpi eq, %arg3, %c0_i32 : i32
    %1 = arith.extui %0 : i1 to i32
    %c0_i32_0 = arith.constant 0 : i32
    %2 = arith.cmpi ne, %1, %c0_i32_0 : i32
    scf.if %2 {
      %cst_12 = arith.constant 0.000000e+00 : f32
      %14 = vector.broadcast %cst_12 : f32 to vector<8x512xf32>
      %c0_13 = arith.constant 0 : index
      %c0_14 = arith.constant 0 : index
      %15 = vector.load %arg8[%c0_13, %c0_14] : memref<8x512xf32, #tpu.memory_space<vmem>>, vector<8x512xf32>
      tpu.vector_store %arg8[%c0_13, %c0_14], %14 {strides = array<i32>} : memref<8x512xf32, #tpu.memory_space<vmem>>, vector<8x512xf32>,
    } else {
    }
    %c0 = arith.constant 0 : index
    %c0_1 = arith.constant 0 : index
    %3 = vector.load %arg8[%c0, %c0_1] : memref<8x512xf32, #tpu.memory_space<vmem>>, vector<8x512xf32>
    %c0_2 = arith.constant 0 : index
    %c0_3 = arith.constant 0 : index
    %c0_4 = arith.constant 0 : index
    %4 = vector.load %arg4[%c0_2, %c0_3, %c0_4] : memref<1x8x128xf32, #tpu.memory_space<vmem>>, vector<1x8x128xf32>
    %5 = vector.shape_cast %4 : vector<1x8x128xf32> to vector<8x128xf32>
    %c0_5 = arith.constant 0 : index
    %c0_6 = arith.constant 0 : index
    %c0_7 = arith.constant 0 : index
    %6 = vector.load %arg5[%c0_5, %c0_6, %c0_7] : memref<1x128x512xf32, #tpu.memory_space<vmem>>, vector<1x128x512xf32>
    %7 = vector.shape_cast %6 : vector<1x128x512xf32> to vector<128x512xf32>
    %cst = arith.constant dense<0.000000e+00> : vector<8x512xf32>
    %8 = tpu.matmul %5, %7, %cst {dimension_numbers = #tpu.dot_dimension_numbers<[1], [0], [0], [1], [0, 0, 1, 1], [], []>} : vector<8x128xf32>, vector<128x512xf32>, vector<8x512xf32> -> vector<8x512xf32>
    %9 = arith.addf %3, %8 : vector<8x512xf32>
    %c0_8 = arith.constant 0 : index
    %c0_9 = arith.constant 0 : index
    %10 = vector.load %arg8[%c0_8, %c0_9] : memref<8x512xf32, #tpu.memory_space<vmem>>, vector<8x512xf32>
    tpu.vector_store %arg8[%c0_8, %c0_9], %9 {strides = array<i32>} : memref<8x512xf32, #tpu.memory_space<vmem>>, vector<8x512xf32>,
    %c0_i32_10 = arith.constant 0 : i32
    %11 = arith.cmpi eq, %arg3, %c0_i32_10 : i32
    %12 = arith.extui %11 : i1 to i32
    %c0_i32_11 = arith.constant 0 : i32
    %13 = arith.cmpi ne, %12, %c0_i32_11 : i32
    scf.if %13 {
      %c0_12 = arith.constant 0 : index
      %c0_13 = arith.constant 0 : index
      %14 = vector.load %arg8[%c0_12, %c0_13] : memref<8x512xf32, #tpu.memory_space<vmem>>, vector<8x512xf32>
      %c0_14 = arith.constant 0 : index
      %c0_15 = arith.constant 0 : index
      %15 = vector.load %arg6[%c0_14, %c0_15] : memref<8x1xf32, #tpu.memory_space<vmem>>, vector<8x1xf32>
      %16 = vector.broadcast %15 : vector<8x1xf32> to vector<8x512xf32>
      %17 = arith.addf %14, %16 : vector<8x512xf32>
      %cst_16 = arith.constant 0.000000e+00 : f32
      %18 = vector.broadcast %cst_16 : f32 to vector<8x512xf32>
      %19 = arith.cmpf ogt, %17, %18 : vector<8x512xf32>
      %cst_17 = arith.constant 2.000000e-01 : f32
      %20 = vector.broadcast %cst_17 : f32 to vector<8x512xf32>
      %21 = arith.mulf %20, %17 : vector<8x512xf32>
      %22 = arith.select %19, %17, %21 : vector<8x512xi1>, vector<8x512xf32>
      %c0_18 = arith.constant 0 : index
      %c0_19 = arith.constant 0 : index
      %c0_20 = arith.constant 0 : index
      %23 = vector.load %arg7[%c0_18, %c0_19, %c0_20] : memref<1x8x512xf32, #tpu.memory_space<vmem>>, vector<1x8x512xf32>
      %24 = vector.shape_cast %23 : vector<1x8x512xf32> to vector<8x512xf32>
      %25 = vector.shape_cast %22 : vector<8x512xf32> to vector<1x8x512xf32>
      tpu.vector_store %arg7[%c0_18, %c0_19, %c0_20], %25 {strides = array<i32>} : memref<1x8x512xf32, #tpu.memory_space<vmem>>, vector<1x8x512xf32>,
    } else {
    }
    return
  }
  func.func @transform_0(%arg0: i32, %arg1: i32, %arg2: i32, %arg3: i32) -> (i32, i32, i32) {
    %c0_i32 = arith.constant 0 : i32
    return %arg0, %arg1, %arg3 : i32, i32, i32
  }
  func.func @transform_1(%arg0: i32, %arg1: i32, %arg2: i32, %arg3: i32) -> (i32, i32, i32) {
    %c0_i32 = arith.constant 0 : i32
    return %arg0, %arg3, %arg2 : i32, i32, i32
  }
  func.func @transform_2(%arg0: i32, %arg1: i32, %arg2: i32, %arg3: i32) -> (i32, i32) {
    %c0_i32 = arith.constant 0 : i32
    %c0_i32_0 = arith.constant 0 : i32
    return %arg1, %c0_i32 : i32, i32
  }
  func.func @transform_3(%arg0: i32, %arg1: i32, %arg2: i32, %arg3: i32) -> (i32, i32, i32) {
    %c0_i32 = arith.constant 0 : i32
    return %arg0, %arg1, %arg2 : i32, i32, i32
  }
}

module attributes {stable_mosaic.version = 11 : i64} {
  func.func @_fused_mm_kernel(%arg0: i32, %arg1: i32, %arg2: i32, %arg3: i32, %arg4: memref<1x8x128xf32, #tpu.memory_space<vmem>>, %arg5: memref<1x128x512xf32, #tpu.memory_space<vmem>>, %arg6: memref<8x1xf32, #tpu.memory_space<vmem>>, %arg7: memref<1x8x512xf32, #tpu.memory_space<vmem>>, %arg8: memref<8x512xf32, #tpu.memory_space<vmem>>) attributes {dimension_semantics = [#tpu.dimension_semantics<parallel>, #tpu.dimension_semantics<parallel>, #tpu.dimension_semantics<parallel>, #tpu.dimension_semantics<arbitrary>], iteration_bounds = array<i64: 1, 1, 16, 1>, scalar_prefetch = 0 : i64, scratch_operands = 1 : i64, tpu.core_type = #tpu.core_type<tc>, window_params = [{transform_indices = @transform_0, window_bounds = array<i64: 1, 8, 128>}, {transform_indices = @transform_1, window_bounds = array<i64: 1, 128, 512>}, {transform_indices = @transform_2, window_bounds = array<i64: 8, 1>}, {transform_indices = @transform_3, window_bounds = array<i64: 1, 8, 512>}]} {
    %c0_i32 = arith.constant 0 : i32
    %0 = arith.cmpi eq, %arg3, %c0_i32 : i32
    %1 = arith.extui %0 : i1 to i32
    %c0_i32_0 = arith.constant 0 : i32
    %2 = arith.cmpi ne, %1, %c0_i32_0 : i32
    scf.if %2 {
      %cst_12 = arith.constant 0.000000e+00 : f32
      %14 = vector.broadcast %cst_12 : f32 to vector<8x512xf32>
      %c0_13 = arith.constant 0 : index
      %c0_14 = arith.constant 0 : index
      %15 = vector.load %arg8[%c0_13, %c0_14] : memref<8x512xf32, #tpu.memory_space<vmem>>, vector<8x512xf32>
      tpu.vector_store %arg8[%c0_13, %c0_14], %14 {strides = array<i32>} : memref<8x512xf32, #tpu.memory_space<vmem>>, vector<8x512xf32>,
    } else {
    }
    %c0 = arith.constant 0 : index
    %c0_1 = arith.constant 0 : index
    %3 = vector.load %arg8[%c0, %c0_1] : memref<8x512xf32, #tpu.memory_space<vmem>>, vector<8x512xf32>
    %c0_2 = arith.constant 0 : index
    %c0_3 = arith.constant 0 : index
    %c0_4 = arith.constant 0 : index
    %4 = vector.load %arg4[%c0_2, %c0_3, %c0_4] : memref<1x8x128xf32, #tpu.memory_space<vmem>>, vector<1x8x128xf32>
    %5 = vector.shape_cast %4 : vector<1x8x128xf32> to vector<8x128xf32>
    %c0_5 = arith.constant 0 : index
    %c0_6 = arith.constant 0 : index
    %c0_7 = arith.constant 0 : index
    %6 = vector.load %arg5[%c0_5, %c0_6, %c0_7] : memref<1x128x512xf32, #tpu.memory_space<vmem>>, vector<1x128x512xf32>
    %7 = vector.shape_cast %6 : vector<1x128x512xf32> to vector<128x512xf32>
    %cst = arith.constant dense<0.000000e+00> : vector<8x512xf32>
    %8 = tpu.matmul %5, %7, %cst {dimension_numbers = #tpu.dot_dimension_numbers<[1], [0], [0], [1], [0, 0, 1, 1], [], []>} : vector<8x128xf32>, vector<128x512xf32>, vector<8x512xf32> -> vector<8x512xf32>
    %9 = arith.addf %3, %8 : vector<8x512xf32>
    %c0_8 = arith.constant 0 : index
    %c0_9 = arith.constant 0 : index
    %10 = vector.load %arg8[%c0_8, %c0_9] : memref<8x512xf32, #tpu.memory_space<vmem>>, vector<8x512xf32>
    tpu.vector_store %arg8[%c0_8, %c0_9], %9 {strides = array<i32>} : memref<8x512xf32, #tpu.memory_space<vmem>>, vector<8x512xf32>,
    %c0_i32_10 = arith.constant 0 : i32
    %11 = arith.cmpi eq, %arg3, %c0_i32_10 : i32
    %12 = arith.extui %11 : i1 to i32
    %c0_i32_11 = arith.constant 0 : i32
    %13 = arith.cmpi ne, %12, %c0_i32_11 : i32
    scf.if %13 {
      %c0_12 = arith.constant 0 : index
      %c0_13 = arith.constant 0 : index
      %14 = vector.load %arg8[%c0_12, %c0_13] : memref<8x512xf32, #tpu.memory_space<vmem>>, vector<8x512xf32>
      %c0_14 = arith.constant 0 : index
      %c0_15 = arith.constant 0 : index
      %15 = vector.load %arg6[%c0_14, %c0_15] : memref<8x1xf32, #tpu.memory_space<vmem>>, vector<8x1xf32>
      %16 = vector.broadcast %15 : vector<8x1xf32> to vector<8x512xf32>
      %17 = arith.addf %14, %16 : vector<8x512xf32>
      %18 = arith.negf %17 : vector<8x512xf32>
      %19 = math.exp %18 : vector<8x512xf32>
      %cst_16 = arith.constant 1.000000e+00 : f32
      %20 = vector.broadcast %cst_16 : f32 to vector<8x512xf32>
      %21 = arith.addf %20, %19 : vector<8x512xf32>
      %22 = arith.divf %20, %21 : vector<8x512xf32>
      %c0_17 = arith.constant 0 : index
      %c0_18 = arith.constant 0 : index
      %c0_19 = arith.constant 0 : index
      %23 = vector.load %arg7[%c0_17, %c0_18, %c0_19] : memref<1x8x512xf32, #tpu.memory_space<vmem>>, vector<1x8x512xf32>
      %24 = vector.shape_cast %23 : vector<1x8x512xf32> to vector<8x512xf32>
      %25 = vector.shape_cast %22 : vector<8x512xf32> to vector<1x8x512xf32>
      tpu.vector_store %arg7[%c0_17, %c0_18, %c0_19], %25 {strides = array<i32>} : memref<1x8x512xf32, #tpu.memory_space<vmem>>, vector<1x8x512xf32>,
    } else {
    }
    return
  }
  func.func @transform_0(%arg0: i32, %arg1: i32, %arg2: i32, %arg3: i32) -> (i32, i32, i32) {
    %c0_i32 = arith.constant 0 : i32
    return %arg0, %arg1, %arg3 : i32, i32, i32
  }
  func.func @transform_1(%arg0: i32, %arg1: i32, %arg2: i32, %arg3: i32) -> (i32, i32, i32) {
    %c0_i32 = arith.constant 0 : i32
    return %arg0, %arg3, %arg2 : i32, i32, i32
  }
  func.func @transform_2(%arg0: i32, %arg1: i32, %arg2: i32, %arg3: i32) -> (i32, i32) {
    %c0_i32 = arith.constant 0 : i32
    %c0_i32_0 = arith.constant 0 : i32
    return %arg1, %c0_i32 : i32, i32
  }
  func.func @transform_3(%arg0: i32, %arg1: i32, %arg2: i32, %arg3: i32) -> (i32, i32, i32) {
    %c0_i32 = arith.constant 0 : i32
    return %arg0, %arg1, %arg2 : i32, i32, i32
  }
}

</mosaic_0001>

<bundles_post_ra>
// kernel: decoder_forward.7
= control target key start
LH: loop header
LB: loop body
LE: loop exit
PB: predicated region body
PF: predicated region fallthrough
CT: control target
= control target key end

     0   :  { %v181_v0 = vmov 0.0   ;;  %vm182_vm0 = vmmov 0   ;;  %s260_s1 = inlined_call_operand.vmem [shape: f32[1,128,128], index: 1, kind: input, shape index: {}]   ;;  %s261_s0 = inlined_call_operand.vmem [shape: f32[1,8,128], index: 0, kind: input, shape index: {}]   ;;  %s262_s2 = inlined_call_operand.vmem [shape: f32[1,128], index: 2, kind: input, shape index: {}]   ;;  %s263_s3 = inlined_call_operand.vmem [shape: f32[1,8,128], index: 3, kind: output, shape index: {}]  }
   0x1   :  { %144 = vmatprep.subr.mxu0 %v181_v0  ;;  %v36_v1 = vld [vmem:[%s260_s1 + $0x78] sm:$0xff]  ;;  %v35_v2 = vld [vmem:[%s260_s1 + $0x70] sm:$0xff]  ;;  %176 = vmatprep.mubr.msk.f32.mxu0 %vm182_vm0, %v181_v0  ;;  %v34_v3 = vld [vmem:[%s260_s1 + $0x68] sm:$0xff] }
   0x2   :  { %145 = vmatpush3.msra.mxu0 %v36_v1  ;;  %v33_v4 = vld [vmem:[%s260_s1 + $0x60] sm:$0xff]  ;;  %v32_v5 = vld [vmem:[%s260_s1 + $0x58] sm:$0xff]  ;;  %v31_v6 = vld [vmem:[%s260_s1 + $0x50] sm:$0xff] }
   0x3   :  { %146 = vmatprep.subr.mxu0 %v181_v0  ;;  %v30_v7 = vld [vmem:[%s260_s1 + $0x48] sm:$0xff]  ;;  %v29_v8 = vld [vmem:[%s260_s1 + $0x40] sm:$0xff]  ;;  %v28_v9 = vld [vmem:[%s260_s1 + $0x38] sm:$0xff] }
   0x4   :  { %147 = vmatpush3.msra.mxu0 %v35_v2  ;;  %v27_v10 = vld [vmem:[%s260_s1 + $0x30] sm:$0xff]  ;;  %v26_v11 = vld [vmem:[%s260_s1 + $0x28] sm:$0xff]  ;;  %v25_v12 = vld [vmem:[%s260_s1 + $0x20] sm:$0xff] }
   0x5   :  { %148 = vmatprep.subr.mxu0 %v181_v0  ;;  %v24_v13 = vld [vmem:[%s260_s1 + $0x18] sm:$0xff]  ;;  %v23_v14 = vld [vmem:[%s260_s1 + $0x10] sm:$0xff]  ;;  %v22_v15 = vld [vmem:[%s260_s1 + $0x8] sm:$0xff] }
   0x6   :  { %149 = vmatpush3.msra.mxu0 %v34_v3  ;;  %v21_v16 = vld [vmem:[%s260_s1] sm:$0xff] }
   0x7   :  { %150 = vmatprep.subr.mxu0 %v181_v0  ;;  %v20_v17 = vld [vmem:[%s261_s0] sm:$0xff] }
   0x8   :  { %151 = vmatpush3.msra.mxu0 %v33_v4  ;;  %v126_v18 = vld [vmem:[%s262_s2] ss:$0 sm:$0xff] }
   0x9   :  { %152 = vmatprep.subr.mxu0 %v181_v0 }
   0xa   :  { %153 = vmatpush3.msra.mxu0 %v32_v5 }
   0xb   :  { %154 = vmatprep.subr.mxu0 %v181_v0 }
   0xc   :  { %155 = vmatpush3.msra.mxu0 %v31_v6 }
   0xd   :  { %156 = vmatprep.subr.mxu0 %v181_v0 }
   0xe   :  { %157 = vmatpush3.msra.mxu0 %v30_v7 }
   0xf   :  { %158 = vmatprep.subr.mxu0 %v181_v0 }
  0x10   :  { %159 = vmatpush3.msra.mxu0 %v29_v8 }
  0x11   :  { %160 = vmatprep.subr.mxu0 %v181_v0 }
  0x12   :  { %161 = vmatpush3.msra.mxu0 %v28_v9 }
  0x13   :  { %162 = vmatprep.subr.mxu0 %v181_v0 }
  0x14   :  { %163 = vmatpush3.msra.mxu0 %v27_v10 }
  0x15   :  { %164 = vmatprep.subr.mxu0 %v181_v0 }
  0x16   :  { %165 = vmatpush3.msra.mxu0 %v26_v11 }
  0x17   :  { %166 = vmatprep.subr.mxu0 %v181_v0 }
  0x18   :  { %167 = vmatpush3.msra.mxu0 %v25_v12 }
  0x19   :  { %168 = vmatprep.subr.mxu0 %v181_v0 }
  0x1a   :  { %169 = vmatpush3.msra.mxu0 %v24_v13 }
  0x1b   :  { %170 = vmatprep.subr.mxu0 %v181_v0 }
  0x1c   :  { %171 = vmatpush3.msra.mxu0 %v23_v14 }
  0x1d   :  { %172 = vmatprep.subr.mxu0 %v181_v0 }
  0x1e   :  { %173 = vmatpush3.msra.mxu0 %v22_v15 }
  0x1f   :  { %174 = vmatprep.subr.mxu0 %v181_v0 }
  0x20   :  { %175 = vmatpush3.msra.mxu0 %v21_v16 }
  0x21   :  { %177 = vmatmul.mubr.f32.vlgmr.msra.gmra.mxu0 %v20_v17 }
  0xe1   :  { %v103_v19 = vpop.f32.mrf.mxu0 }
  0xe2   :  { %v120_v20 = vadd.f32 %v126_v18, %v103_v19 }
  0xe3   :  { %v178_v21 = vpop.f32.mrf.mxu0 }
  0xe4   :  { %121 = vst [vmem:[%s263_s3] sm:$0xff] %v120_v20 }

// kernel: decoder_forward.8
= control target key start
LH: loop header
LB: loop body
LE: loop exit
PB: predicated region body
PF: predicated region fallthrough
CT: control target
= control target key end

     0   :  { %s674_s12 = smov 0   ;;  %s676_s13 = smov 0   ;;  %s735_s0 = inlined_call_operand.vmem [shape: f32[8,8,128], index: 0, kind: input, shape index: {}]   ;;  %s736_s1 = inlined_call_operand.vmem [shape: f32[8,128,128], index: 1, kind: input, shape index: {}]   ;;  %s737_s2 = inlined_call_operand.vmem [shape: f32[8,1], index: 2, kind: input, shape index: {}]   ;;  %s738_s3 = inlined_call_operand.vmem [shape: f32[8,8,128], index: 3, kind: output, shape index: {}]  }
   0x1   :  { %s678_s14 = smov 0  }
   0x2 LB: > { %s39_s15 = sadd.s32 1, %s645_s13  ;;  %p539_p0 = scmp.ge.s32.totalorder %s649_s14, 1  ;;  %s649_s14 = sphi %s678_s14, %s13_s14   ;;  %s645_s13 = sphi %s676_s13, %s740_s13   ;;  %s641_s12 = sphi %s674_s12, %s739_s12  }
   0x3   : > { %p41_p1 = scmp.ge.s32.totalorder %s39_s15, 8  ;;  %p207_p2 = scmp.lt.s32.totalorder %s649_s14, 9 }
   0x5   : > { %s742_s15 = smov (%p41_p1, %s39_s15), 0  ;;  %p208_p3 = pnand %p539_p0, %p207_p2 }
   0x6   : > { %p257_p4 = scmp.lt.s32.totalorder (!%p208_p3), %s641_s12, 7 }
   0x7   : > { %211 = sbr.rel (%p208_p3) target bundleno = 246 (0xf6), region = 32 }
   0xc   : > { %v393_v0 = vld [vmem:[%s737_s2] sm:$0xff]  ;;  %v651_v1 = vmov 0.0   ;;  %vm652_vm0 = vmmov 0   ;;  %s744_s12 = smov (!%p257_p4, %s641_s12), 7  ;;  %v653_v2 = vmov 0  }
   0xd   : > { %564 = vmatprep.subr.mxu0 %v651_v1  ;;  %596 = vmatprep.mubr.msk.f32.mxu0 %vm652_vm0, %v651_v1  ;;  %s546_s18 = sshll.u32 %s744_s12, 7  ;;  %s540_s22 = sshll.u32 %s744_s12, 3 }
   0xe   : > { %626 = vset.pattern.permute.xlu0 %v653_v2  ;;  %s701_s21 = scalar_lea.vmem %s736_s1, %s546_s18  ;;  %s266_s25 = scalar_lea.vmem %s735_s0, %s540_s22 }
   0xf   : > { %396 = vperm.xlu0 %626, %v393_v0   ;;  %v316_v3 = vld [vmem:[%s701_s21 + $0x78] sm:$0xff]  ;;  %v315_v4 = vld [vmem:[%s701_s21 + $0x70] sm:$0xff]  ;;  %v314_v5 = vld [vmem:[%s701_s21 + $0x68] sm:$0xff]  ;;  %s293_s28 = scalar_lea.vmem %s738_s3, %s540_s22 }
  0x10   : > { %565 = vmatpush3.msra.mxu0 %v316_v3  ;;  %v313_v6 = vld [vmem:[%s701_s21 + $0x60] sm:$0xff]  ;;  %v312_v7 = vld [vmem:[%s701_s21 + $0x58] sm:$0xff]  ;;  %v311_v8 = vld [vmem:[%s701_s21 + $0x50] sm:$0xff] }
  0x11   : > { %566 = vmatprep.subr.mxu0 %v651_v1  ;;  %v310_v9 = vld [vmem:[%s701_s21 + $0x48] sm:$0xff]  ;;  %v309_v10 = vld [vmem:[%s701_s21 + $0x40] sm:$0xff]  ;;  %v308_v11 = vld [vmem:[%s701_s21 + $0x38] sm:$0xff] }
  0x12   : > { %567 = vmatpush3.msra.mxu0 %v315_v4  ;;  %v307_v12 = vld [vmem:[%s701_s21 + $0x30] sm:$0xff]  ;;  %v306_v13 = vld [vmem:[%s701_s21 + $0x28] sm:$0xff]  ;;  %v305_v14 = vld [vmem:[%s701_s21 + $0x20] sm:$0xff] }
  0x13   : > { %568 = vmatprep.subr.mxu0 %v651_v1  ;;  %v304_v15 = vld [vmem:[%s701_s21 + $0x18] sm:$0xff]  ;;  %v303_v16 = vld [vmem:[%s701_s21 + $0x10] sm:$0xff]  ;;  %v302_v17 = vld [vmem:[%s701_s21 + $0x8] sm:$0xff] }
  0x14   : > { %569 = vmatpush3.msra.mxu0 %v314_v5  ;;  %v301_v18 = vld [vmem:[%s701_s21] sm:$0xff] }
  0x15   : > { %570 = vmatprep.subr.mxu0 %v651_v1  ;;  %v300_v19 = vld [vmem:[%s266_s25] sm:$0xff] }
  0x16   : > { %571 = vmatpush3.msra.mxu0 %v313_v6 }
  0x17   : > { %572 = vmatprep.subr.mxu0 %v651_v1 }
  0x18   : > { %573 = vmatpush3.msra.mxu0 %v312_v7 }
  0x19   : > { %574 = vmatprep.subr.mxu0 %v651_v1 }
  0x1a   : > { %575 = vmatpush3.msra.mxu0 %v311_v8 }
  0x1b   : > { %576 = vmatprep.subr.mxu0 %v651_v1 }
  0x1c   : > { %577 = vmatpush3.msra.mxu0 %v310_v9 }
  0x1d   : > { %578 = vmatprep.subr.mxu0 %v651_v1 }
  0x1e   : > { %579 = vmatpush3.msra.mxu0 %v309_v10 }
  0x1f   : > { %580 = vmatprep.subr.mxu0 %v651_v1 }
  0x20   : > { %581 = vmatpush3.msra.mxu0 %v308_v11 }
  0x21   : > { %582 = vmatprep.subr.mxu0 %v651_v1 }
  0x22   : > { %583 = vmatpush3.msra.mxu0 %v307_v12 }
  0x23   : > { %584 = vmatprep.subr.mxu0 %v651_v1 }
  0x24   : > { %585 = vmatpush3.msra.mxu0 %v306_v13 }
  0x25   : > { %586 = vmatprep.subr.mxu0 %v651_v1 }
  0x26   : > { %587 = vmatpush3.msra.mxu0 %v305_v14 }
  0x27   : > { %588 = vmatprep.subr.mxu0 %v651_v1 }
  0x28   : > { %589 = vmatpush3.msra.mxu0 %v304_v15 }
  0x29   : > { %590 = vmatprep.subr.mxu0 %v651_v1 }
  0x2a   : > { %591 = vmatpush3.msra.mxu0 %v303_v16 }
  0x2b   : > { %592 = vmatprep.subr.mxu0 %v651_v1 }
  0x2c   : > { %593 = vmatpush3.msra.mxu0 %v302_v17 }
  0x2d   : > { %594 = vmatprep.subr.mxu0 %v651_v1 }
  0x2e   : > { %595 = vmatpush3.msra.mxu0 %v301_v18 }
  0x2f   : > { %597 = vmatmul.mubr.f32.vlgmr.msra.gmra.mxu0 %v300_v19 }
  0x8a   : > { %v397_v20 = vpop.permute.xlu0 %396 }
  0xef   : > { %v383_v21 = vpop.f32.mrf.mxu0 }
  0xf0   : > { %v399_v22 = vadd.f32 %v397_v20, %v383_v21 }
  0xf1   : > { %v598_v23 = vpop.f32.mrf.mxu0 }
  0xf2   : > { %vm400_vm1 = vcmp.gt.f32.partialorder %v399_v22, 0.0  ;;  %v401_v24 = vmul.f32 0.2, %v399_v22 }
  0xf4   : > { %v402_v25 = vsel %vm400_vm1, %v399_v22, %v401_v24 }
  0xf5   : > { %403 = vst [vmem:[%s293_s28] sm:$0xff] %v402_v25 }
  0xf6 PF: > { %s13_s14 = sadd.s32 1, %s649_s14   ;;  %s739_s12 = smov %s645_s13 }
  0xf7   : > { %p10_p5 = scmp.ge.s32.totalorder %s13_s14, 10   ;;  %s740_s13 = smov %s742_s15 }
  0xf9   :  { %12 = sbr.rel (!%p10_p5) target bundleno = 2 (0x2), region = 76 }

// kernel: decoder_forward.11
= control target key start
LH: loop header
LB: loop body
LE: loop exit
PB: predicated region body
PF: predicated region fallthrough
CT: control target
= control target key end

     0   :  { %s995_s12 = smov 0   ;;  %s997_s13 = smov 0   ;;  %s1298_s0 = inlined_call_operand.vmem [shape: f32[8,8,128], index: 0, kind: input, shape index: {}]   ;;  %s1299_s1 = inlined_call_operand.vmem [shape: f32[8,128,1024], index: 1, kind: input, shape index: {}]   ;;  %s1300_s2 = inlined_call_operand.vmem [shape: f32[8,1], index: 2, kind: input, shape index: {}]   ;;  %s1301_s3 = inlined_call_operand.vmem [shape: f32[8,8,1024], index: 3, kind: output, shape index: {}]  }
   0x1   :  { %s999_s14 = smov 0   ;;  %s1001_s15 = smov 0  }
   0x2   :  { %s1003_s16 = smov 0   ;;  %s1005_s17 = smov 0  }
   0x3   :  { %s1007_s18 = smov 0  }
   0x4 LB: > { %s31_s19 = sadd.s32 1, %s963_s16  ;;  %s39_s20 = sadd.s32 1, %s967_s17  ;;  %s971_s18 = sphi %s1007_s18, %s13_s18   ;;  %s967_s17 = sphi %s1005_s17, %s1307_s17   ;;  %s963_s16 = sphi %s1003_s16, %s1306_s16   ;;  %s959_s15 = sphi %s1001_s15, %s1305_s15   ;;  %s955_s14 = sphi %s999_s14, %s1304_s14   ;;  %s951_s13 = sphi %s997_s13, %s1303_s13   ;;  %s947_s12 = sphi %s995_s12, %s1302_s12  }
   0x5   : > { %p33_p0 = scmp.ge.s32.totalorder %s31_s19, 2  ;;  %p87_p1 = scmp.ne.s32.totalorder %s951_s13, %s947_s12 }
   0x6   : > { %p88_p2 = scmp.eq.s32.totalorder %s971_s18, 0  ;;  %s80_s24 = sadd.s32 1, %s951_s13 }
   0x7   : > { %s1309_s19 = smov (%p33_p0, %s31_s19), 0  ;;  %s1311_s20 = smov (!%p33_p0, %s39_s20), %s967_s17 }
   0x8   : > { %p89_p3 = por %p88_p2, %p87_p1  ;;  %p41_p4 = scmp.ge.s32.totalorder %s1311_s20, 8 }
   0x9   : > { %s76_s21 = ssub.s32 %s963_s16, %s1309_s19  ;;  %p845_p6 = scmp.ge.s32.totalorder %s971_s18, 16 }
   0xa   : > { %s1313_s20 = smov (%p41_p4, %s1311_s20), 0 }
   0xb   : > { %s73_s22 = ssub.s32 %s967_s17, %s1313_s20  ;;  %176 = sbr.rel (%p845_p6) target bundleno = 55 (0x37), region = 20 }
   0xc   : > { %s77_s23 = sor.u32 %s76_s21, %s73_s22 }
   0xd   : > { %p78_p5 = scmp.eq.s32.totalorder %s77_s23, 0 }
   0xf   : > { %s1046_s25 = scalar_select %p78_p5, %s951_s13, %s80_s24  }
  0x10   : > { %192 = sbr.rel (!%p89_p3) target bundleno = 55 (0x37), region = 28  ;;  %s194_s26 = sand.u32 (%p89_p3), 1, %s951_s13  }
  0x11   : > { %s847_s27 = sshll.u32 (%p89_p3), %s963_s16, 2  ;;  %s846_s28 = sshll.u32 (%p89_p3), %s194_s26, 9 }
  0x12   : > { %s848_s29 = sshll.u32 (%p89_p3), %s967_s17, 7  ;;  %s1060_s8 = scalar_lea.vmem (%p89_p3), [#allocation3], %s846_s28 }
  0x13   : > { %s202_s30 = sadd.s32 (%p89_p3), %s848_s29, %s847_s27 }
  0x14   : > { %s849_s4 = sshll.u32 (%p89_p3), %s202_s30, 3 }
  0x15   : > { %s1055_s7 = scalar_lea.vmem %s1299_s1, %s849_s4 }
  0x16   : > { %v217_v0 = vld [vmem:[%s1055_s7] sm:$0xff]  ;;  %v219_v1 = vld [vmem:[%s1055_s7 + $0x8] sm:$0xff]  ;;  %v221_v2 = vld [vmem:[%s1055_s7 + $0x10] sm:$0xff] }
  0x17   : > { %218 = vst [vmem:[%s1060_s8] sm:$0xff] %v217_v0  ;;  %220 = vst [vmem:[%s1060_s8 + $0x8] sm:$0xff] %v219_v1  ;;  %v223_v3 = vld [vmem:[%s1055_s7 + $0x18] sm:$0xff]  ;;  %v225_v4 = vld [vmem:[%s1055_s7 + $0x40] sm:$0xff] }
  0x18   : > { %222 = vst [vmem:[%s1060_s8 + $0x10] sm:$0xff] %v221_v2  ;;  %v227_v5 = vld [vmem:[%s1055_s7 + $0x48] sm:$0xff]  ;;  %224 = vst [vmem:[%s1060_s8 + $0x18] sm:$0xff] %v223_v3  ;;  %v229_v6 = vld [vmem:[%s1055_s7 + $0x50] sm:$0xff] }
  0x19   : > { %226 = vst [vmem:[%s1060_s8 + $0x20] sm:$0xff] %v225_v4  ;;  %228 = vst [vmem:[%s1060_s8 + $0x28] sm:$0xff] %v227_v5  ;;  %v231_v7 = vld [vmem:[%s1055_s7 + $0x58] sm:$0xff]  ;;  %v233_v8 = vld [vmem:[%s1055_s7 + $0x80] sm:$0xff] }
  0x1a   : > { %230 = vst [vmem:[%s1060_s8 + $0x30] sm:$0xff] %v229_v6  ;;  %232 = vst [vmem:[%s1060_s8 + $0x38] sm:$0xff] %v231_v7  ;;  %v235_v9 = vld [vmem:[%s1055_s7 + $0x88] sm:$0xff]  ;;  %v237_v10 = vld [vmem:[%s1055_s7 + $0x90] sm:$0xff] }
  0x1b   : > { %234 = vst [vmem:[%s1060_s8 + $0x40] sm:$0xff] %v233_v8  ;;  %v239_v11 = vld [vmem:[%s1055_s7 + $0x98] sm:$0xff]  ;;  %236 = vst [vmem:[%s1060_s8 + $0x48] sm:$0xff] %v235_v9  ;;  %v241_v12 = vld [vmem:[%s1055_s7 + $0xc0] sm:$0xff] }
  0x1c   : > { %238 = vst [vmem:[%s1060_s8 + $0x50] sm:$0xff] %v237_v10  ;;  %240 = vst [vmem:[%s1060_s8 + $0x58] sm:$0xff] %v239_v11  ;;  %v243_v13 = vld [vmem:[%s1055_s7 + $0xc8] sm:$0xff]  ;;  %v245_v14 = vld [vmem:[%s1055_s7 + $0xd0] sm:$0xff] }
  0x1d   : > { %242 = vst [vmem:[%s1060_s8 + $0x60] sm:$0xff] %v241_v12  ;;  %244 = vst [vmem:[%s1060_s8 + $0x68] sm:$0xff] %v243_v13  ;;  %v247_v15 = vld [vmem:[%s1055_s7 + $0xd8] sm:$0xff]  ;;  %v249_v16 = vld [vmem:[%s1055_s7 + $0x100] sm:$0xff] }
  0x1e   : > { %246 = vst [vmem:[%s1060_s8 + $0x70] sm:$0xff] %v245_v14  ;;  %v251_v17 = vld [vmem:[%s1055_s7 + $0x108] sm:$0xff]  ;;  %248 = vst [vmem:[%s1060_s8 + $0x78] sm:$0xff] %v247_v15  ;;  %v253_v18 = vld [vmem:[%s1055_s7 + $0x110] sm:$0xff] }
  0x1f   : > { %250 = vst [vmem:[%s1060_s8 + $0x80] sm:$0xff] %v249_v16  ;;  %252 = vst [vmem:[%s1060_s8 + $0x88] sm:$0xff] %v251_v17  ;;  %v255_v19 = vld [vmem:[%s1055_s7 + $0x118] sm:$0xff]  ;;  %v257_v20 = vld [vmem:[%s1055_s7 + $0x140] sm:$0xff] }
  0x20   : > { %254 = vst [vmem:[%s1060_s8 + $0x90] sm:$0xff] %v253_v18  ;;  %256 = vst [vmem:[%s1060_s8 + $0x98] sm:$0xff] %v255_v19  ;;  %v259_v21 = vld [vmem:[%s1055_s7 + $0x148] sm:$0xff]  ;;  %v261_v22 = vld [vmem:[%s1055_s7 + $0x150] sm:$0xff] }
  0x21   : > { %258 = vst [vmem:[%s1060_s8 + $0xa0] sm:$0xff] %v257_v20  ;;  %v263_v23 = vld [vmem:[%s1055_s7 + $0x158] sm:$0xff]  ;;  %260 = vst [vmem:[%s1060_s8 + $0xa8] sm:$0xff] %v259_v21  ;;  %v265_v24 = vld [vmem:[%s1055_s7 + $0x180] sm:$0xff] }
  0x22   : > { %262 = vst [vmem:[%s1060_s8 + $0xb0] sm:$0xff] %v261_v22  ;;  %264 = vst [vmem:[%s1060_s8 + $0xb8] sm:$0xff] %v263_v23  ;;  %v267_v25 = vld [vmem:[%s1055_s7 + $0x188] sm:$0xff]  ;;  %v269_v26 = vld [vmem:[%s1055_s7 + $0x190] sm:$0xff] }
  0x23   : > { %266 = vst [vmem:[%s1060_s8 + $0xc0] sm:$0xff] %v265_v24  ;;  %268 = vst [vmem:[%s1060_s8 + $0xc8] sm:$0xff] %v267_v25  ;;  %v271_v27 = vld [vmem:[%s1055_s7 + $0x198] sm:$0xff]  ;;  %v273_v28 = vld [vmem:[%s1055_s7 + $0x1c0] sm:$0xff] }
  0x24   : > { %270 = vst [vmem:[%s1060_s8 + $0xd0] sm:$0xff] %v269_v26  ;;  %v275_v29 = vld [vmem:[%s1055_s7 + $0x1c8] sm:$0xff]  ;;  %272 = vst [vmem:[%s1060_s8 + $0xd8] sm:$0xff] %v271_v27  ;;  %v277_v30 = vld [vmem:[%s1055_s7 + $0x1d0] sm:$0xff] }
  0x25   : > { %274 = vst [vmem:[%s1060_s8 + $0xe0] sm:$0xff] %v273_v28  ;;  %276 = vst [vmem:[%s1060_s8 + $0xe8] sm:$0xff] %v275_v29  ;;  %v279_v31 = vld [vmem:[%s1055_s7 + $0x1d8] sm:$0xff]  ;;  %v281_v32 = vld [vmem:[%s1055_s7 + $0x200] sm:$0xff] }
  0x26   : > { %278 = vst [vmem:[%s1060_s8 + $0xf0] sm:$0xff] %v277_v30  ;;  %280 = vst [vmem:[%s1060_s8 + $0xf8] sm:$0xff] %v279_v31  ;;  %v283_v33 = vld [vmem:[%s1055_s7 + $0x208] sm:$0xff]  ;;  %v285_v34 = vld [vmem:[%s1055_s7 + $0x210] sm:$0xff] }
  0x27   : > { %282 = vst [vmem:[%s1060_s8 + $0x100] sm:$0xff] %v281_v32  ;;  %v287_v35 = vld [vmem:[%s1055_s7 + $0x218] sm:$0xff]  ;;  %284 = vst [vmem:[%s1060_s8 + $0x108] sm:$0xff] %v283_v33  ;;  %v289_v36 = vld [vmem:[%s1055_s7 + $0x240] sm:$0xff] }
  0x28   : > { %286 = vst [vmem:[%s1060_s8 + $0x110] sm:$0xff] %v285_v34  ;;  %288 = vst [vmem:[%s1060_s8 + $0x118] sm:$0xff] %v287_v35  ;;  %v291_v37 = vld [vmem:[%s1055_s7 + $0x248] sm:$0xff]  ;;  %v293_v38 = vld [vmem:[%s1055_s7 + $0x250] sm:$0xff] }
  0x29   : > { %290 = vst [vmem:[%s1060_s8 + $0x120] sm:$0xff] %v289_v36  ;;  %292 = vst [vmem:[%s1060_s8 + $0x128] sm:$0xff] %v291_v37  ;;  %v295_v39 = vld [vmem:[%s1055_s7 + $0x258] sm:$0xff]  ;;  %v297_v40 = vld [vmem:[%s1055_s7 + $0x280] sm:$0xff] }
  0x2a   : > { %294 = vst [vmem:[%s1060_s8 + $0x130] sm:$0xff] %v293_v38  ;;  %v299_v41 = vld [vmem:[%s1055_s7 + $0x288] sm:$0xff]  ;;  %296 = vst [vmem:[%s1060_s8 + $0x138] sm:$0xff] %v295_v39  ;;  %v301_v42 = vld [vmem:[%s1055_s7 + $0x290] sm:$0xff] }
  0x2b   : > { %298 = vst [vmem:[%s1060_s8 + $0x140] sm:$0xff] %v297_v40  ;;  %300 = vst [vmem:[%s1060_s8 + $0x148] sm:$0xff] %v299_v41  ;;  %v303_v43 = vld [vmem:[%s1055_s7 + $0x298] sm:$0xff]  ;;  %v305_v44 = vld [vmem:[%s1055_s7 + $0x2c0] sm:$0xff] }
  0x2c   : > { %302 = vst [vmem:[%s1060_s8 + $0x150] sm:$0xff] %v301_v42  ;;  %304 = vst [vmem:[%s1060_s8 + $0x158] sm:$0xff] %v303_v43  ;;  %v307_v45 = vld [vmem:[%s1055_s7 + $0x2c8] sm:$0xff]  ;;  %v309_v46 = vld [vmem:[%s1055_s7 + $0x2d0] sm:$0xff] }
  0x2d   : > { %306 = vst [vmem:[%s1060_s8 + $0x160] sm:$0xff] %v305_v44  ;;  %v311_v47 = vld [vmem:[%s1055_s7 + $0x2d8] sm:$0xff]  ;;  %308 = vst [vmem:[%s1060_s8 + $0x168] sm:$0xff] %v307_v45  ;;  %v313_v48 = vld [vmem:[%s1055_s7 + $0x300] sm:$0xff] }
  0x2e   : > { %310 = vst [vmem:[%s1060_s8 + $0x170] sm:$0xff] %v309_v46  ;;  %312 = vst [vmem:[%s1060_s8 + $0x178] sm:$0xff] %v311_v47  ;;  %v315_v49 = vld [vmem:[%s1055_s7 + $0x308] sm:$0xff]  ;;  %v317_v50 = vld [vmem:[%s1055_s7 + $0x310] sm:$0xff] }
  0x2f   : > { %314 = vst [vmem:[%s1060_s8 + $0x180] sm:$0xff] %v313_v48  ;;  %316 = vst [vmem:[%s1060_s8 + $0x188] sm:$0xff] %v315_v49  ;;  %v319_v51 = vld [vmem:[%s1055_s7 + $0x318] sm:$0xff]  ;;  %v321_v52 = vld [vmem:[%s1055_s7 + $0x340] sm:$0xff] }
  0x30   : > { %318 = vst [vmem:[%s1060_s8 + $0x190] sm:$0xff] %v317_v50  ;;  %v323_v53 = vld [vmem:[%s1055_s7 + $0x348] sm:$0xff]  ;;  %320 = vst [vmem:[%s1060_s8 + $0x198] sm:$0xff] %v319_v51  ;;  %v325_v54 = vld [vmem:[%s1055_s7 + $0x350] sm:$0xff] }
  0x31   : > { %322 = vst [vmem:[%s1060_s8 + $0x1a0] sm:$0xff] %v321_v52  ;;  %324 = vst [vmem:[%s1060_s8 + $0x1a8] sm:$0xff] %v323_v53  ;;  %v327_v55 = vld [vmem:[%s1055_s7 + $0x358] sm:$0xff]  ;;  %v329_v56 = vld [vmem:[%s1055_s7 + $0x380] sm:$0xff] }
  0x32   : > { %326 = vst [vmem:[%s1060_s8 + $0x1b0] sm:$0xff] %v325_v54  ;;  %328 = vst [vmem:[%s1060_s8 + $0x1b8] sm:$0xff] %v327_v55  ;;  %v331_v57 = vld [vmem:[%s1055_s7 + $0x388] sm:$0xff]  ;;  %v333_v58 = vld [vmem:[%s1055_s7 + $0x390] sm:$0xff] }
  0x33   : > { %330 = vst [vmem:[%s1060_s8 + $0x1c0] sm:$0xff] %v329_v56  ;;  %v335_v59 = vld [vmem:[%s1055_s7 + $0x398] sm:$0xff]  ;;  %332 = vst [vmem:[%s1060_s8 + $0x1c8] sm:$0xff] %v331_v57  ;;  %v337_v60 = vld [vmem:[%s1055_s7 + $0x3c0] sm:$0xff] }
  0x34   : > { %334 = vst [vmem:[%s1060_s8 + $0x1d0] sm:$0xff] %v333_v58  ;;  %336 = vst [vmem:[%s1060_s8 + $0x1d8] sm:$0xff] %v335_v59  ;;  %v339_v61 = vld [vmem:[%s1055_s7 + $0x3c8] sm:$0xff]  ;;  %v341_v62 = vld [vmem:[%s1055_s7 + $0x3d0] sm:$0xff] }
  0x35   : > { %338 = vst [vmem:[%s1060_s8 + $0x1e0] sm:$0xff] %v337_v60  ;;  %340 = vst [vmem:[%s1060_s8 + $0x1e8] sm:$0xff] %v339_v61  ;;  %v343_v63 = vld [vmem:[%s1055_s7 + $0x3d8] sm:$0xff] }
  0x36   : > { %342 = vst [vmem:[%s1060_s8 + $0x1f0] sm:$0xff] %v341_v62  ;;  %344 = vst [vmem:[%s1060_s8 + $0x1f8] sm:$0xff] %v343_v63 }
  0x37 PF: > { %p850_p7 = scmp.ge.s32.totalorder %s971_s18, 1  ;;  %p349_p8 = scmp.lt.s32.totalorder %s971_s18, 17 }
  0x39   : > { %p350_p9 = pnand %p850_p7, %p349_p8 }
  0x3a   : > { %s356_s9 = sand.u32 (!%p350_p9), 1, %s947_s12   ;;  %p401_p10 = scmp.lt.s32.totalorder (!%p350_p9), %s959_s15, 7 }
  0x3b   : > { %353 = sbr.rel (%p350_p9) target bundleno = 302 (0x12e), region = 51  ;;  %s851_s21 = sshll.u32 (!%p350_p9), %s356_s9, 9 }
  0x3c   : > { %s1193_s22 = scalar_lea.vmem (!%p350_p9), [#allocation3], %s851_s21  ;;  %s853_s27 = sshll.u32 (!%p350_p9), %s955_s14, 2 }
  0x3d   : > { %p422_p11 = scmp.lt.s32.totalorder (!%p350_p9), %s853_s27, 7 }
  0x40   : > { %v665_v0 = vld [vmem:[%s1300_s2] sm:$0xff]  ;;  %v973_v1 = vmov 0.0   ;;  %v974_v2 = vmov 0   ;;  %v505_v3 = vld [vmem:[%s1193_s22 + $0x1e8] sm:$0xff]  ;;  %v507_v4 = vld [vmem:[%s1193_s22 + $0x1f8] sm:$0xff]  ;;  %s1315_s15 = smov (!%p401_p10, %s959_s15), 7 }
  0x41   : > { %572 = vmatprep.mubr.f32.mxu0 %v973_v1  ;;  %643 = vmatprep.mubr.f32.mxu1 %v973_v1  ;;  %v504_v5 = vld [vmem:[%s1193_s22 + $0x1e0] sm:$0xff]  ;;  %v506_v6 = vld [vmem:[%s1193_s22 + $0x1f0] sm:$0xff]  ;;  %v501_v7 = vld [vmem:[%s1193_s22 + $0x1c8] sm:$0xff]  ;;  %s852_s12 = sshll.u32 %s1315_s15, 3  ;;  %s1317_s27 = smov (!%p422_p11, %s853_s27), 7 }
  0x42   : > { %916 = vset.pattern.permute.xlu0 %v974_v2  ;;  %508 = vmatprep.subr.mxu0 %v505_v3  ;;  %v503_v8 = vld [vmem:[%s1193_s22 + $0x1d8] sm:$0xff]  ;;  %v500_v9 = vld [vmem:[%s1193_s22 + $0x1c0] sm:$0xff]  ;;  %v502_v10 = vld [vmem:[%s1193_s22 + $0x1d0] sm:$0xff]  ;;  %s410_s26 = scalar_lea.vmem %s1298_s0, %s852_s12  ;;  %s427_s28 = sadd.s32 %s852_s12, %s1317_s27 }
  0x43   : > { %668 = vperm.xlu0 %916, %v665_v0   ;;  %579 = vmatprep.subr.mxu1 %v507_v4  ;;  %v497_v11 = vld [vmem:[%s1193_s22 + $0x1a8] sm:$0xff]  ;;  %v499_v12 = vld [vmem:[%s1193_s22 + $0x1b8] sm:$0xff]  ;;  %v496_v13 = vld [vmem:[%s1193_s22 + $0x1a0] sm:$0xff]  ;;  %s855_s29 = sshll.u32 %s427_s28, 3 }
  0x44   : > { %509 = vmatpush1.msra.mxu0 %v504_v5  ;;  %580 = vmatpush1.msra.mxu1 %v506_v6  ;;  %v498_v14 = vld [vmem:[%s1193_s22 + $0x1b0] sm:$0xff]  ;;  %v493_v15 = vld [vmem:[%s1193_s22 + $0x188] sm:$0xff]  ;;  %v495_v16 = vld [vmem:[%s1193_s22 + $0x198] sm:$0xff]  ;;  %s429_s5 = scalar_lea.vmem %s1301_s3, %s855_s29 }
  0x45   : > { %510 = vmatprep.subr.mxu0 %v501_v7  ;;  %581 = vmatprep.subr.mxu1 %v503_v8  ;;  %v492_v17 = vld [vmem:[%s1193_s22 + $0x180] sm:$0xff]  ;;  %v494_v18 = vld [vmem:[%s1193_s22 + $0x190] sm:$0xff]  ;;  %v489_v19 = vld [vmem:[%s1193_s22 + $0x168] sm:$0xff] }
  0x46   : > { %511 = vmatpush1.msra.mxu0 %v500_v9  ;;  %582 = vmatpush1.msra.mxu1 %v502_v10  ;;  %v491_v20 = vld [vmem:[%s1193_s22 + $0x178] sm:$0xff]  ;;  %v488_v21 = vld [vmem:[%s1193_s22 + $0x160] sm:$0xff]  ;;  %v490_v22 = vld [vmem:[%s1193_s22 + $0x170] sm:$0xff] }
  0x47   : > { %512 = vmatprep.subr.mxu0 %v497_v11  ;;  %583 = vmatprep.subr.mxu1 %v499_v12  ;;  %v485_v23 = vld [vmem:[%s1193_s22 + $0x148] sm:$0xff]  ;;  %v487_v24 = vld [vmem:[%s1193_s22 + $0x158] sm:$0xff]  ;;  %v484_v25 = vld [vmem:[%s1193_s22 + $0x140] sm:$0xff] }
  0x48   : > { %513 = vmatpush1.msra.mxu0 %v496_v13  ;;  %584 = vmatpush1.msra.mxu1 %v498_v14  ;;  %v486_v26 = vld [vmem:[%s1193_s22 + $0x150] sm:$0xff]  ;;  %v481_v27 = vld [vmem:[%s1193_s22 + $0x128] sm:$0xff]  ;;  %v483_v28 = vld [vmem:[%s1193_s22 + $0x138] sm:$0xff] }
  0x49   : > { %514 = vmatprep.subr.mxu0 %v493_v15  ;;  %585 = vmatprep.subr.mxu1 %v495_v16  ;;  %v480_v29 = vld [vmem:[%s1193_s22 + $0x120] sm:$0xff]  ;;  %v482_v30 = vld [vmem:[%s1193_s22 + $0x130] sm:$0xff]  ;;  %v477_v31 = vld [vmem:[%s1193_s22 + $0x108] sm:$0xff] }
  0x4a   : > { %515 = vmatpush1.msra.mxu0 %v492_v17  ;;  %586 = vmatpush1.msra.mxu1 %v494_v18  ;;  %v479_v32 = vld [vmem:[%s1193_s22 + $0x118] sm:$0xff]  ;;  %v476_v33 = vld [vmem:[%s1193_s22 + $0x100] sm:$0xff]  ;;  %v478_v34 = vld [vmem:[%s1193_s22 + $0x110] sm:$0xff] }
  0x4b   : > { %516 = vmatprep.subr.mxu0 %v489_v19  ;;  %587 = vmatprep.subr.mxu1 %v491_v20  ;;  %v473_v35 = vld [vmem:[%s1193_s22 + $0xe8] sm:$0xff]  ;;  %v475_v36 = vld [vmem:[%s1193_s22 + $0xf8] sm:$0xff]  ;;  %v472_v37 = vld [vmem:[%s1193_s22 + $0xe0] sm:$0xff] }
  0x4c   : > { %517 = vmatpush1.msra.mxu0 %v488_v21  ;;  %588 = vmatpush1.msra.mxu1 %v490_v22  ;;  %v474_v38 = vld [vmem:[%s1193_s22 + $0xf0] sm:$0xff]  ;;  %v469_v39 = vld [vmem:[%s1193_s22 + $0xc8] sm:$0xff]  ;;  %v471_v40 = vld [vmem:[%s1193_s22 + $0xd8] sm:$0xff] }
  0x4d   : > { %518 = vmatprep.subr.mxu0 %v485_v23  ;;  %589 = vmatprep.subr.mxu1 %v487_v24  ;;  %v468_v41 = vld [vmem:[%s1193_s22 + $0xc0] sm:$0xff]  ;;  %v470_v42 = vld [vmem:[%s1193_s22 + $0xd0] sm:$0xff]  ;;  %v465_v43 = vld [vmem:[%s1193_s22 + $0xa8] sm:$0xff] }
  0x4e   : > { %519 = vmatpush1.msra.mxu0 %v484_v25  ;;  %590 = vmatpush1.msra.mxu1 %v486_v26  ;;  %v467_v44 = vld [vmem:[%s1193_s22 + $0xb8] sm:$0xff]  ;;  %v464_v45 = vld [vmem:[%s1193_s22 + $0xa0] sm:$0xff]  ;;  %v466_v46 = vld [vmem:[%s1193_s22 + $0xb0] sm:$0xff] }
  0x4f   : > { %520 = vmatprep.subr.mxu0 %v481_v27  ;;  %591 = vmatprep.subr.mxu1 %v483_v28  ;;  %v461_v47 = vld [vmem:[%s1193_s22 + $0x88] sm:$0xff]  ;;  %v463_v48 = vld [vmem:[%s1193_s22 + $0x98] sm:$0xff]  ;;  %v460_v49 = vld [vmem:[%s1193_s22 + $0x80] sm:$0xff] }
  0x50   : > { %521 = vmatpush1.msra.mxu0 %v480_v29  ;;  %592 = vmatpush1.msra.mxu1 %v482_v30  ;;  %v462_v50 = vld [vmem:[%s1193_s22 + $0x90] sm:$0xff]  ;;  %v457_v51 = vld [vmem:[%s1193_s22 + $0x68] sm:$0xff]  ;;  %v459_v52 = vld [vmem:[%s1193_s22 + $0x78] sm:$0xff] }
  0x51   : > { %522 = vmatprep.subr.mxu0 %v477_v31  ;;  %593 = vmatprep.subr.mxu1 %v479_v32  ;;  %v456_v53 = vld [vmem:[%s1193_s22 + $0x60] sm:$0xff]  ;;  %v458_v54 = vld [vmem:[%s1193_s22 + $0x70] sm:$0xff]  ;;  %v453_v55 = vld [vmem:[%s1193_s22 + $0x48] sm:$0xff] }
  0x52   : > { %523 = vmatpush1.msra.mxu0 %v476_v33  ;;  %594 = vmatpush1.msra.mxu1 %v478_v34  ;;  %v455_v56 = vld [vmem:[%s1193_s22 + $0x58] sm:$0xff]  ;;  %v452_v57 = vld [vmem:[%s1193_s22 + $0x40] sm:$0xff]  ;;  %v454_v58 = vld [vmem:[%s1193_s22 + $0x50] sm:$0xff] }
  0x53   : > { %524 = vmatprep.subr.mxu0 %v473_v35  ;;  %595 = vmatprep.subr.mxu1 %v475_v36  ;;  %v449_v59 = vld [vmem:[%s1193_s22 + $0x28] sm:$0xff]  ;;  %v451_v60 = vld [vmem:[%s1193_s22 + $0x38] sm:$0xff]  ;;  %v448_v61 = vld [vmem:[%s1193_s22 + $0x20] sm:$0xff] }
  0x54   : > { %525 = vmatpush1.msra.mxu0 %v472_v37  ;;  %596 = vmatpush1.msra.mxu1 %v474_v38  ;;  %v450_v62 = vld [vmem:[%s1193_s22 + $0x30] sm:$0xff]  ;;  %v445_v63 = vld [vmem:[%s1193_s22 + $0x8] sm:$0xff]  ;;  %v447_v0 = vld [vmem:[%s1193_s22 + $0x18] sm:$0xff] }
  0x55   : > { %526 = vmatprep.subr.mxu0 %v469_v39  ;;  %597 = vmatprep.subr.mxu1 %v471_v40  ;;  %v444_v1 = vld [vmem:[%s1193_s22] sm:$0xff]  ;;  %v446_v2 = vld [vmem:[%s1193_s22 + $0x10] sm:$0xff] }
  0x56   : > { %527 = vmatpush1.msra.mxu0 %v468_v41  ;;  %598 = vmatpush1.msra.mxu1 %v470_v42  ;;  %v443_v3 = vld [vmem:[%s410_s26] sm:$0xff] }
  0x57   : > { %528 = vmatprep.subr.mxu0 %v465_v43  ;;  %599 = vmatprep.subr.mxu1 %v467_v44 }
  0x58   : > { %529 = vmatpush1.msra.mxu0 %v464_v45  ;;  %600 = vmatpush1.msra.mxu1 %v466_v46 }
  0x59   : > { %530 = vmatprep.subr.mxu0 %v461_v47  ;;  %601 = vmatprep.subr.mxu1 %v463_v48 }
  0x5a   : > { %531 = vmatpush1.msra.mxu0 %v460_v49  ;;  %602 = vmatpush1.msra.mxu1 %v462_v50 }
  0x5b   : > { %532 = vmatprep.subr.mxu0 %v457_v51  ;;  %603 = vmatprep.subr.mxu1 %v459_v52 }
  0x5c   : > { %533 = vmatpush1.msra.mxu0 %v456_v53  ;;  %604 = vmatpush1.msra.mxu1 %v458_v54 }
  0x5d   : > { %534 = vmatprep.subr.mxu0 %v453_v55  ;;  %605 = vmatprep.subr.mxu1 %v455_v56 }
  0x5e   : > { %535 = vmatpush1.msra.mxu0 %v452_v57  ;;  %606 = vmatpush1.msra.mxu1 %v454_v58 }
  0x5f   : > { %536 = vmatprep.subr.mxu0 %v449_v59  ;;  %607 = vmatprep.subr.mxu1 %v451_v60 }
  0x60   : > { %537 = vmatpush1.msra.mxu0 %v448_v61  ;;  %608 = vmatpush1.msra.mxu1 %v450_v62 }
  0x61   : > { %538 = vmatprep.subr.mxu0 %v445_v63  ;;  %609 = vmatprep.subr.mxu1 %v447_v0 }
  0x62   : > { %539 = vmatpush1.msra.mxu0 %v444_v1  ;;  %610 = vmatpush1.msra.mxu1 %v446_v2 }
  0x63   : > { %573 = vmatmul.mubr.f32.vlgmr.msra.gmra.mxu0 %v443_v3  ;;  %644 = vmatmul.mubr.f32.vlgmr.msra.gmra.mxu1 %v443_v3 }
  0xbe   : > { %v669_v4 = vpop.permute.xlu0 %668 }
 0x123   : > { %v574_v5 = vpop.f32.mrf.mxu0  ;;  %v645_v6 = vpop.f32.mrf.mxu1 }
 0x124   : > { %v671_v7 = vadd.f32 %v669_v4, %v574_v5  ;;  %v673_v8 = vadd.f32 %v669_v4, %v645_v6 }
 0x125   : > { %v576_v9 = vpop.f32.mrf.mxu0  ;;  %v647_v10 = vpop.f32.mrf.mxu1 }
 0x126   : > { %vm675_vm0 = vcmp.gt.f32.partialorder %v671_v7, 0.0  ;;  %v679_v11 = vmul.f32 0.2, %v671_v7  ;;  %vm677_vm1 = vcmp.gt.f32.partialorder %v673_v8, 0.0  ;;  %v681_v12 = vmul.f32 0.2, %v673_v8 }
 0x127   : > { %v672_v13 = vadd.f32 %v669_v4, %v576_v9  ;;  %v674_v14 = vadd.f32 %v669_v4, %v647_v10 }
 0x128   : > { %v683_v15 = vsel %vm675_vm0, %v671_v7, %v679_v11  ;;  %v685_v16 = vsel %vm677_vm1, %v673_v8, %v681_v12 }
 0x129   : > { %687 = vst [vmem:[%s429_s5] sm:$0xff] %v683_v15  ;;  %689 = vst [vmem:[%s429_s5 + $0x10] sm:$0xff] %v685_v16  ;;  %vm676_vm2 = vcmp.gt.f32.partialorder %v672_v13, 0.0  ;;  %v680_v17 = vmul.f32 0.2, %v672_v13  ;;  %vm678_vm3 = vcmp.gt.f32.partialorder %v674_v14, 0.0 }
 0x12a   : > { %v682_v18 = vmul.f32 0.2, %v674_v14 }
 0x12b   : > { %v684_v19 = vsel %vm676_vm2, %v672_v13, %v680_v17 }
 0x12c   : > { %v686_v20 = vsel %vm678_vm3, %v674_v14, %v682_v18  ;;  %688 = vst [vmem:[%s429_s5 + $0x8] sm:$0xff] %v684_v19 }
 0x12d   : > { %690 = vst [vmem:[%s429_s5 + $0x18] sm:$0xff] %v686_v20 }
 0x12e PF: > { %s13_s18 = sadd.s32 1, %s971_s18   ;;  %s1302_s12 = smov %s951_s13 }
 0x12f   : > { %p10_p12 = scmp.ge.s32.totalorder %s13_s18, 18   ;;  %s1303_s13 = smov %s1046_s25 }
 0x130   : > { %s1304_s14 = smov %s963_s16  ;;  %s1305_s15 = smov %s967_s17 }
 0x131   : > { %s1306_s16 = smov %s1309_s19  ;;  %s1307_s17 = smov %s1313_s20 }
 0x132   :  { %12 = sbr.rel (!%p10_p12) target bundleno = 4 (0x4), region = 104 }

// kernel: decoder_forward.12
= control target key start
LH: loop header
LB: loop body
LE: loop exit
PB: predicated region body
PF: predicated region fallthrough
CT: control target
= control target key end

     0   :  { %s962_s12 = smov 0   ;;  %s964_s13 = smov 0   ;;  %s1231_s0 = inlined_call_operand.vmem [shape: f32[1,8,128], index: 0, kind: input, shape index: {}]   ;;  %s1232_s1 = inlined_call_operand.vmem [shape: f32[1,128,8192], index: 1, kind: input, shape index: {}]   ;;  %s1233_s2 = inlined_call_operand.vmem [shape: f32[8,1], index: 2, kind: input, shape index: {}]   ;;  %s1234_s3 = inlined_call_operand.vmem [shape: f32[1,8,8192], index: 3, kind: output, shape index: {}]  }
   0x1   :  { %s966_s14 = smov 0   ;;  %s968_s15 = smov 0  }
   0x2   :  { %s970_s16 = smov 0  }
   0x3 LB: > { %s31_s17 = sadd.s32 1, %s934_s15  ;;  %p87_p1 = scmp.ne.s32.totalorder %s926_s13, %s922_s12  ;;  %s938_s16 = sphi %s970_s16, %s13_s16   ;;  %s934_s15 = sphi %s968_s15, %s1238_s15   ;;  %s930_s14 = sphi %s966_s14, %s1237_s14   ;;  %s926_s13 = sphi %s964_s13, %s1236_s13   ;;  %s922_s12 = sphi %s962_s12, %s1235_s12  }
   0x4   : > { %p33_p0 = scmp.ge.s32.totalorder %s31_s17, 16  ;;  %p88_p2 = scmp.eq.s32.totalorder %s938_s16, 0 }
   0x5   : > { %s80_s19 = sadd.s32 1, %s926_s13  ;;  %p846_p5 = scmp.ge.s32.totalorder %s938_s16, 16 }
   0x6   : > { %s1240_s17 = smov (%p33_p0, %s31_s17), 0  ;;  %p89_p3 = por %p88_p2, %p87_p1 }
   0x7   : > { %s76_s18 = ssub.s32 %s934_s15, %s1240_s17  ;;  %189 = sbr.rel (%p846_p5) target bundleno = 48 (0x30), region = 24 }
   0x8   : > { %p78_p4 = scmp.eq.s32.totalorder %s76_s18, 0 }
   0xa   : > { %s997_s20 = scalar_select %p78_p4, %s926_s13, %s80_s19  }
   0xc   : > { %192 = sbr.rel (!%p89_p3) target bundleno = 48 (0x30), region = 28  ;;  %s194_s21 = sand.u32 (%p89_p3), 1, %s926_s13  }
   0xd   : > { %s856_s22 = sshll.u32 (%p89_p3), %s934_s15, 5  ;;  %s847_s23 = sshll.u32 (%p89_p3), %s194_s21, 9 }
   0xe   : > { %s1005_s26 = scalar_lea.vmem (%p89_p3), %s1232_s1, %s856_s22  ;;  %s1010_s27 = scalar_lea.vmem (%p89_p3), [#allocation3], %s847_s23 }
   0xf   : > { %v217_v0 = vld [vmem:[%s1005_s26] sm:$0xff] (%p89_p3)  ;;  %v219_v1 = vld [vmem:[%s1005_s26 + $0x8] sm:$0xff] (%p89_p3)  ;;  %v221_v2 = vld [vmem:[%s1005_s26 + $0x10] sm:$0xff] (%p89_p3) }
  0x10   : > { %218 = vst [vmem:[%s1010_s27] sm:$0xff] (%p89_p3), %v217_v0  ;;  %220 = vst [vmem:[%s1010_s27 + $0x8] sm:$0xff] (%p89_p3), %v219_v1  ;;  %v223_v3 = vld [vmem:[%s1005_s26 + $0x18] sm:$0xff] (%p89_p3)  ;;  %v225_v4 = vld [vmem:[%s1005_s26 + $0x200] sm:$0xff] (%p89_p3) }
  0x11   : > { %222 = vst [vmem:[%s1010_s27 + $0x10] sm:$0xff] %v221_v2  ;;  %v227_v5 = vld [vmem:[%s1005_s26 + $0x208] sm:$0xff]  ;;  %224 = vst [vmem:[%s1010_s27 + $0x18] sm:$0xff] %v223_v3  ;;  %v229_v6 = vld [vmem:[%s1005_s26 + $0x210] sm:$0xff] }
  0x12   : > { %226 = vst [vmem:[%s1010_s27 + $0x20] sm:$0xff] %v225_v4  ;;  %228 = vst [vmem:[%s1010_s27 + $0x28] sm:$0xff] %v227_v5  ;;  %v231_v7 = vld [vmem:[%s1005_s26 + $0x218] sm:$0xff]  ;;  %v233_v8 = vld [vmem:[%s1005_s26 + $0x400] sm:$0xff] }
  0x13   : > { %230 = vst [vmem:[%s1010_s27 + $0x30] sm:$0xff] %v229_v6  ;;  %232 = vst [vmem:[%s1010_s27 + $0x38] sm:$0xff] %v231_v7  ;;  %v235_v9 = vld [vmem:[%s1005_s26 + $0x408] sm:$0xff]  ;;  %v237_v10 = vld [vmem:[%s1005_s26 + $0x410] sm:$0xff] }
  0x14   : > { %234 = vst [vmem:[%s1010_s27 + $0x40] sm:$0xff] %v233_v8  ;;  %v239_v11 = vld [vmem:[%s1005_s26 + $0x418] sm:$0xff]  ;;  %236 = vst [vmem:[%s1010_s27 + $0x48] sm:$0xff] %v235_v9  ;;  %v241_v12 = vld [vmem:[%s1005_s26 + $0x600] sm:$0xff] }
  0x15   : > { %238 = vst [vmem:[%s1010_s27 + $0x50] sm:$0xff] %v237_v10  ;;  %240 = vst [vmem:[%s1010_s27 + $0x58] sm:$0xff] %v239_v11  ;;  %v243_v13 = vld [vmem:[%s1005_s26 + $0x608] sm:$0xff]  ;;  %v245_v14 = vld [vmem:[%s1005_s26 + $0x610] sm:$0xff] }
  0x16   : > { %242 = vst [vmem:[%s1010_s27 + $0x60] sm:$0xff] %v241_v12  ;;  %244 = vst [vmem:[%s1010_s27 + $0x68] sm:$0xff] %v243_v13  ;;  %v247_v15 = vld [vmem:[%s1005_s26 + $0x618] sm:$0xff]  ;;  %v249_v16 = vld [vmem:[%s1005_s26 + $0x800] sm:$0xff] }
  0x17   : > { %246 = vst [vmem:[%s1010_s27 + $0x70] sm:$0xff] %v245_v14  ;;  %v251_v17 = vld [vmem:[%s1005_s26 + $0x808] sm:$0xff]  ;;  %248 = vst [vmem:[%s1010_s27 + $0x78] sm:$0xff] %v247_v15  ;;  %v253_v18 = vld [vmem:[%s1005_s26 + $0x810] sm:$0xff] }
  0x18   : > { %250 = vst [vmem:[%s1010_s27 + $0x80] sm:$0xff] %v249_v16  ;;  %252 = vst [vmem:[%s1010_s27 + $0x88] sm:$0xff] %v251_v17  ;;  %v255_v19 = vld [vmem:[%s1005_s26 + $0x818] sm:$0xff]  ;;  %v257_v20 = vld [vmem:[%s1005_s26 + $0xa00] sm:$0xff] }
  0x19   : > { %254 = vst [vmem:[%s1010_s27 + $0x90] sm:$0xff] %v253_v18  ;;  %256 = vst [vmem:[%s1010_s27 + $0x98] sm:$0xff] %v255_v19  ;;  %v259_v21 = vld [vmem:[%s1005_s26 + $0xa08] sm:$0xff]  ;;  %v261_v22 = vld [vmem:[%s1005_s26 + $0xa10] sm:$0xff] }
  0x1a   : > { %258 = vst [vmem:[%s1010_s27 + $0xa0] sm:$0xff] %v257_v20  ;;  %v263_v23 = vld [vmem:[%s1005_s26 + $0xa18] sm:$0xff]  ;;  %260 = vst [vmem:[%s1010_s27 + $0xa8] sm:$0xff] %v259_v21  ;;  %v265_v24 = vld [vmem:[%s1005_s26 + $0xc00] sm:$0xff] }
  0x1b   : > { %262 = vst [vmem:[%s1010_s27 + $0xb0] sm:$0xff] %v261_v22  ;;  %264 = vst [vmem:[%s1010_s27 + $0xb8] sm:$0xff] %v263_v23  ;;  %v267_v25 = vld [vmem:[%s1005_s26 + $0xc08] sm:$0xff]  ;;  %v269_v26 = vld [vmem:[%s1005_s26 + $0xc10] sm:$0xff] }
  0x1c   : > { %266 = vst [vmem:[%s1010_s27 + $0xc0] sm:$0xff] %v265_v24  ;;  %268 = vst [vmem:[%s1010_s27 + $0xc8] sm:$0xff] %v267_v25  ;;  %v271_v27 = vld [vmem:[%s1005_s26 + $0xc18] sm:$0xff]  ;;  %v273_v28 = vld [vmem:[%s1005_s26 + $0xe00] sm:$0xff] }
  0x1d   : > { %270 = vst [vmem:[%s1010_s27 + $0xd0] sm:$0xff] %v269_v26  ;;  %v275_v29 = vld [vmem:[%s1005_s26 + $0xe08] sm:$0xff]  ;;  %272 = vst [vmem:[%s1010_s27 + $0xd8] sm:$0xff] %v271_v27  ;;  %v277_v30 = vld [vmem:[%s1005_s26 + $0xe10] sm:$0xff] }
  0x1e   : > { %274 = vst [vmem:[%s1010_s27 + $0xe0] sm:$0xff] %v273_v28  ;;  %276 = vst [vmem:[%s1010_s27 + $0xe8] sm:$0xff] %v275_v29  ;;  %v279_v31 = vld [vmem:[%s1005_s26 + $0xe18] sm:$0xff]  ;;  %v281_v32 = vld [vmem:[%s1005_s26 + $0x1000] sm:$0xff] }
  0x1f   : > { %278 = vst [vmem:[%s1010_s27 + $0xf0] sm:$0xff] %v277_v30  ;;  %280 = vst [vmem:[%s1010_s27 + $0xf8] sm:$0xff] %v279_v31  ;;  %v283_v33 = vld [vmem:[%s1005_s26 + $0x1008] sm:$0xff]  ;;  %v285_v34 = vld [vmem:[%s1005_s26 + $0x1010] sm:$0xff] }
  0x20   : > { %282 = vst [vmem:[%s1010_s27 + $0x100] sm:$0xff] %v281_v32  ;;  %v287_v35 = vld [vmem:[%s1005_s26 + $0x1018] sm:$0xff]  ;;  %284 = vst [vmem:[%s1010_s27 + $0x108] sm:$0xff] %v283_v33  ;;  %v289_v36 = vld [vmem:[%s1005_s26 + $0x1200] sm:$0xff] }
  0x21   : > { %286 = vst [vmem:[%s1010_s27 + $0x110] sm:$0xff] %v285_v34  ;;  %288 = vst [vmem:[%s1010_s27 + $0x118] sm:$0xff] %v287_v35  ;;  %v291_v37 = vld [vmem:[%s1005_s26 + $0x1208] sm:$0xff]  ;;  %v293_v38 = vld [vmem:[%s1005_s26 + $0x1210] sm:$0xff] }
  0x22   : > { %290 = vst [vmem:[%s1010_s27 + $0x120] sm:$0xff] %v289_v36  ;;  %292 = vst [vmem:[%s1010_s27 + $0x128] sm:$0xff] %v291_v37  ;;  %v295_v39 = vld [vmem:[%s1005_s26 + $0x1218] sm:$0xff]  ;;  %v297_v40 = vld [vmem:[%s1005_s26 + $0x1400] sm:$0xff] }
  0x23   : > { %294 = vst [vmem:[%s1010_s27 + $0x130] sm:$0xff] %v293_v38  ;;  %v299_v41 = vld [vmem:[%s1005_s26 + $0x1408] sm:$0xff]  ;;  %296 = vst [vmem:[%s1010_s27 + $0x138] sm:$0xff] %v295_v39  ;;  %v301_v42 = vld [vmem:[%s1005_s26 + $0x1410] sm:$0xff] }
  0x24   : > { %298 = vst [vmem:[%s1010_s27 + $0x140] sm:$0xff] %v297_v40  ;;  %300 = vst [vmem:[%s1010_s27 + $0x148] sm:$0xff] %v299_v41  ;;  %v303_v43 = vld [vmem:[%s1005_s26 + $0x1418] sm:$0xff]  ;;  %v305_v44 = vld [vmem:[%s1005_s26 + $0x1600] sm:$0xff] }
  0x25   : > { %302 = vst [vmem:[%s1010_s27 + $0x150] sm:$0xff] %v301_v42  ;;  %304 = vst [vmem:[%s1010_s27 + $0x158] sm:$0xff] %v303_v43  ;;  %v307_v45 = vld [vmem:[%s1005_s26 + $0x1608] sm:$0xff]  ;;  %v309_v46 = vld [vmem:[%s1005_s26 + $0x1610] sm:$0xff] }
  0x26   : > { %306 = vst [vmem:[%s1010_s27 + $0x160] sm:$0xff] %v305_v44  ;;  %v311_v47 = vld [vmem:[%s1005_s26 + $0x1618] sm:$0xff]  ;;  %308 = vst [vmem:[%s1010_s27 + $0x168] sm:$0xff] %v307_v45  ;;  %v313_v48 = vld [vmem:[%s1005_s26 + $0x1800] sm:$0xff] }
  0x27   : > { %310 = vst [vmem:[%s1010_s27 + $0x170] sm:$0xff] %v309_v46  ;;  %312 = vst [vmem:[%s1010_s27 + $0x178] sm:$0xff] %v311_v47  ;;  %v315_v49 = vld [vmem:[%s1005_s26 + $0x1808] sm:$0xff]  ;;  %v317_v50 = vld [vmem:[%s1005_s26 + $0x1810] sm:$0xff] }
  0x28   : > { %314 = vst [vmem:[%s1010_s27 + $0x180] sm:$0xff] %v313_v48  ;;  %316 = vst [vmem:[%s1010_s27 + $0x188] sm:$0xff] %v315_v49  ;;  %v319_v51 = vld [vmem:[%s1005_s26 + $0x1818] sm:$0xff]  ;;  %v321_v52 = vld [vmem:[%s1005_s26 + $0x1a00] sm:$0xff] }
  0x29   : > { %318 = vst [vmem:[%s1010_s27 + $0x190] sm:$0xff] %v317_v50  ;;  %v323_v53 = vld [vmem:[%s1005_s26 + $0x1a08] sm:$0xff]  ;;  %320 = vst [vmem:[%s1010_s27 + $0x198] sm:$0xff] %v319_v51  ;;  %v325_v54 = vld [vmem:[%s1005_s26 + $0x1a10] sm:$0xff] }
  0x2a   : > { %322 = vst [vmem:[%s1010_s27 + $0x1a0] sm:$0xff] %v321_v52  ;;  %324 = vst [vmem:[%s1010_s27 + $0x1a8] sm:$0xff] %v323_v53  ;;  %v327_v55 = vld [vmem:[%s1005_s26 + $0x1a18] sm:$0xff]  ;;  %v329_v56 = vld [vmem:[%s1005_s26 + $0x1c00] sm:$0xff] }
  0x2b   : > { %326 = vst [vmem:[%s1010_s27 + $0x1b0] sm:$0xff] %v325_v54  ;;  %328 = vst [vmem:[%s1010_s27 + $0x1b8] sm:$0xff] %v327_v55  ;;  %v331_v57 = vld [vmem:[%s1005_s26 + $0x1c08] sm:$0xff]  ;;  %v333_v58 = vld [vmem:[%s1005_s26 + $0x1c10] sm:$0xff] }
  0x2c   : > { %330 = vst [vmem:[%s1010_s27 + $0x1c0] sm:$0xff] %v329_v56  ;;  %v335_v59 = vld [vmem:[%s1005_s26 + $0x1c18] sm:$0xff]  ;;  %332 = vst [vmem:[%s1010_s27 + $0x1c8] sm:$0xff] %v331_v57  ;;  %v337_v60 = vld [vmem:[%s1005_s26 + $0x1e00] sm:$0xff] }
  0x2d   : > { %334 = vst [vmem:[%s1010_s27 + $0x1d0] sm:$0xff] %v333_v58  ;;  %336 = vst [vmem:[%s1010_s27 + $0x1d8] sm:$0xff] %v335_v59  ;;  %v339_v61 = vld [vmem:[%s1005_s26 + $0x1e08] sm:$0xff]  ;;  %v341_v62 = vld [vmem:[%s1005_s26 + $0x1e10] sm:$0xff] }
  0x2e   : > { %338 = vst [vmem:[%s1010_s27 + $0x1e0] sm:$0xff] %v337_v60  ;;  %340 = vst [vmem:[%s1010_s27 + $0x1e8] sm:$0xff] %v339_v61  ;;  %v343_v63 = vld [vmem:[%s1005_s26 + $0x1e18] sm:$0xff] }
  0x2f   : > { %342 = vst [vmem:[%s1010_s27 + $0x1f0] sm:$0xff] %v341_v62  ;;  %344 = vst [vmem:[%s1010_s27 + $0x1f8] sm:$0xff] %v343_v63 }
  0x30 PF: > { %p850_p6 = scmp.ge.s32.totalorder %s938_s16, 1  ;;  %p349_p7 = scmp.lt.s32.totalorder %s938_s16, 17 }
  0x32   : > { %p350_p8 = pnand %p850_p6, %p349_p7 }
  0x33   : > { %s356_s28 = sand.u32 (!%p350_p8), 1, %s922_s12   ;;  %s852_s8 = sshll.u32 (!%p350_p8), %s930_s14, 2 }
  0x34   : > { %353 = sbr.rel (%p350_p8) target bundleno = 295 (0x127), region = 51  ;;  %s851_s4 = sshll.u32 (!%p350_p8), %s356_s28, 9 }
  0x35   : > { %s1143_s5 = scalar_lea.vmem (!%p350_p8), [#allocation3], %s851_s4  ;;  %p422_p9 = scmp.lt.s32.totalorder (!%p350_p8), %s852_s8, 63 }
  0x39   : > { %v665_v0 = vld [vmem:[%s1233_s2] sm:$0xff]  ;;  %v940_v1 = vmov 0.0   ;;  %v941_v2 = vmov 0   ;;  %v505_v3 = vld [vmem:[%s1143_s5 + $0x1e8] sm:$0xff]  ;;  %v507_v4 = vld [vmem:[%s1143_s5 + $0x1f8] sm:$0xff]  ;;  %s1242_s8 = smov (!%p422_p9, %s852_s8), 63 }
  0x3a   : > { %572 = vmatprep.mubr.f32.mxu0 %v940_v1  ;;  %643 = vmatprep.mubr.f32.mxu1 %v940_v1  ;;  %v504_v5 = vld [vmem:[%s1143_s5 + $0x1e0] sm:$0xff]  ;;  %v506_v6 = vld [vmem:[%s1143_s5 + $0x1f0] sm:$0xff]  ;;  %v501_v7 = vld [vmem:[%s1143_s5 + $0x1c8] sm:$0xff]  ;;  %s853_s9 = sshll.u32 %s1242_s8, 3 }
  0x3b   : > { %899 = vset.pattern.permute.xlu0 %v941_v2  ;;  %508 = vmatprep.subr.mxu0 %v505_v3  ;;  %v503_v8 = vld [vmem:[%s1143_s5 + $0x1d8] sm:$0xff]  ;;  %v500_v9 = vld [vmem:[%s1143_s5 + $0x1c0] sm:$0xff]  ;;  %v502_v10 = vld [vmem:[%s1143_s5 + $0x1d0] sm:$0xff]  ;;  %s429_s12 = scalar_lea.vmem %s1234_s3, %s853_s9 }
  0x3c   : > { %668 = vperm.xlu0 %899, %v665_v0   ;;  %579 = vmatprep.subr.mxu1 %v507_v4  ;;  %v497_v11 = vld [vmem:[%s1143_s5 + $0x1a8] sm:$0xff]  ;;  %v499_v12 = vld [vmem:[%s1143_s5 + $0x1b8] sm:$0xff]  ;;  %v496_v13 = vld [vmem:[%s1143_s5 + $0x1a0] sm:$0xff] }
  0x3d   : > { %509 = vmatpush1.msra.mxu0 %v504_v5  ;;  %580 = vmatpush1.msra.mxu1 %v506_v6  ;;  %v498_v14 = vld [vmem:[%s1143_s5 + $0x1b0] sm:$0xff]  ;;  %v493_v15 = vld [vmem:[%s1143_s5 + $0x188] sm:$0xff]  ;;  %v495_v16 = vld [vmem:[%s1143_s5 + $0x198] sm:$0xff] }
  0x3e   : > { %510 = vmatprep.subr.mxu0 %v501_v7  ;;  %581 = vmatprep.subr.mxu1 %v503_v8  ;;  %v492_v17 = vld [vmem:[%s1143_s5 + $0x180] sm:$0xff]  ;;  %v494_v18 = vld [vmem:[%s1143_s5 + $0x190] sm:$0xff]  ;;  %v489_v19 = vld [vmem:[%s1143_s5 + $0x168] sm:$0xff] }
  0x3f   : > { %511 = vmatpush1.msra.mxu0 %v500_v9  ;;  %582 = vmatpush1.msra.mxu1 %v502_v10  ;;  %v491_v20 = vld [vmem:[%s1143_s5 + $0x178] sm:$0xff]  ;;  %v488_v21 = vld [vmem:[%s1143_s5 + $0x160] sm:$0xff]  ;;  %v490_v22 = vld [vmem:[%s1143_s5 + $0x170] sm:$0xff] }
  0x40   : > { %512 = vmatprep.subr.mxu0 %v497_v11  ;;  %583 = vmatprep.subr.mxu1 %v499_v12  ;;  %v485_v23 = vld [vmem:[%s1143_s5 + $0x148] sm:$0xff]  ;;  %v487_v24 = vld [vmem:[%s1143_s5 + $0x158] sm:$0xff]  ;;  %v484_v25 = vld [vmem:[%s1143_s5 + $0x140] sm:$0xff] }
  0x41   : > { %513 = vmatpush1.msra.mxu0 %v496_v13  ;;  %584 = vmatpush1.msra.mxu1 %v498_v14  ;;  %v486_v26 = vld [vmem:[%s1143_s5 + $0x150] sm:$0xff]  ;;  %v481_v27 = vld [vmem:[%s1143_s5 + $0x128] sm:$0xff]  ;;  %v483_v28 = vld [vmem:[%s1143_s5 + $0x138] sm:$0xff] }
  0x42   : > { %514 = vmatprep.subr.mxu0 %v493_v15  ;;  %585 = vmatprep.subr.mxu1 %v495_v16  ;;  %v480_v29 = vld [vmem:[%s1143_s5 + $0x120] sm:$0xff]  ;;  %v482_v30 = vld [vmem:[%s1143_s5 + $0x130] sm:$0xff]  ;;  %v477_v31 = vld [vmem:[%s1143_s5 + $0x108] sm:$0xff] }
  0x43   : > { %515 = vmatpush1.msra.mxu0 %v492_v17  ;;  %586 = vmatpush1.msra.mxu1 %v494_v18  ;;  %v479_v32 = vld [vmem:[%s1143_s5 + $0x118] sm:$0xff]  ;;  %v476_v33 = vld [vmem:[%s1143_s5 + $0x100] sm:$0xff]  ;;  %v478_v34 = vld [vmem:[%s1143_s5 + $0x110] sm:$0xff] }
  0x44   : > { %516 = vmatprep.subr.mxu0 %v489_v19  ;;  %587 = vmatprep.subr.mxu1 %v491_v20  ;;  %v473_v35 = vld [vmem:[%s1143_s5 + $0xe8] sm:$0xff]  ;;  %v475_v36 = vld [vmem:[%s1143_s5 + $0xf8] sm:$0xff]  ;;  %v472_v37 = vld [vmem:[%s1143_s5 + $0xe0] sm:$0xff] }
  0x45   : > { %517 = vmatpush1.msra.mxu0 %v488_v21  ;;  %588 = vmatpush1.msra.mxu1 %v490_v22  ;;  %v474_v38 = vld [vmem:[%s1143_s5 + $0xf0] sm:$0xff]  ;;  %v469_v39 = vld [vmem:[%s1143_s5 + $0xc8] sm:$0xff]  ;;  %v471_v40 = vld [vmem:[%s1143_s5 + $0xd8] sm:$0xff] }
  0x46   : > { %518 = vmatprep.subr.mxu0 %v485_v23  ;;  %589 = vmatprep.subr.mxu1 %v487_v24  ;;  %v468_v41 = vld [vmem:[%s1143_s5 + $0xc0] sm:$0xff]  ;;  %v470_v42 = vld [vmem:[%s1143_s5 + $0xd0] sm:$0xff]  ;;  %v465_v43 = vld [vmem:[%s1143_s5 + $0xa8] sm:$0xff] }
  0x47   : > { %519 = vmatpush1.msra.mxu0 %v484_v25  ;;  %590 = vmatpush1.msra.mxu1 %v486_v26  ;;  %v467_v44 = vld [vmem:[%s1143_s5 + $0xb8] sm:$0xff]  ;;  %v464_v45 = vld [vmem:[%s1143_s5 + $0xa0] sm:$0xff]  ;;  %v466_v46 = vld [vmem:[%s1143_s5 + $0xb0] sm:$0xff] }
  0x48   : > { %520 = vmatprep.subr.mxu0 %v481_v27  ;;  %591 = vmatprep.subr.mxu1 %v483_v28  ;;  %v461_v47 = vld [vmem:[%s1143_s5 + $0x88] sm:$0xff]  ;;  %v463_v48 = vld [vmem:[%s1143_s5 + $0x98] sm:$0xff]  ;;  %v460_v49 = vld [vmem:[%s1143_s5 + $0x80] sm:$0xff] }
  0x49   : > { %521 = vmatpush1.msra.mxu0 %v480_v29  ;;  %592 = vmatpush1.msra.mxu1 %v482_v30  ;;  %v462_v50 = vld [vmem:[%s1143_s5 + $0x90] sm:$0xff]  ;;  %v457_v51 = vld [vmem:[%s1143_s5 + $0x68] sm:$0xff]  ;;  %v459_v52 = vld [vmem:[%s1143_s5 + $0x78] sm:$0xff] }
  0x4a   : > { %522 = vmatprep.subr.mxu0 %v477_v31  ;;  %593 = vmatprep.subr.mxu1 %v479_v32  ;;  %v456_v53 = vld [vmem:[%s1143_s5 + $0x60] sm:$0xff]  ;;  %v458_v54 = vld [vmem:[%s1143_s5 + $0x70] sm:$0xff]  ;;  %v453_v55 = vld [vmem:[%s1143_s5 + $0x48] sm:$0xff] }
  0x4b   : > { %523 = vmatpush1.msra.mxu0 %v476_v33  ;;  %594 = vmatpush1.msra.mxu1 %v478_v34  ;;  %v455_v56 = vld [vmem:[%s1143_s5 + $0x58] sm:$0xff]  ;;  %v452_v57 = vld [vmem:[%s1143_s5 + $0x40] sm:$0xff]  ;;  %v454_v58 = vld [vmem:[%s1143_s5 + $0x50] sm:$0xff] }
  0x4c   : > { %524 = vmatprep.subr.mxu0 %v473_v35  ;;  %595 = vmatprep.subr.mxu1 %v475_v36  ;;  %v449_v59 = vld [vmem:[%s1143_s5 + $0x28] sm:$0xff]  ;;  %v451_v60 = vld [vmem:[%s1143_s5 + $0x38] sm:$0xff]  ;;  %v448_v61 = vld [vmem:[%s1143_s5 + $0x20] sm:$0xff] }
  0x4d   : > { %525 = vmatpush1.msra.mxu0 %v472_v37  ;;  %596 = vmatpush1.msra.mxu1 %v474_v38  ;;  %v450_v62 = vld [vmem:[%s1143_s5 + $0x30] sm:$0xff]  ;;  %v445_v63 = vld [vmem:[%s1143_s5 + $0x8] sm:$0xff]  ;;  %v447_v0 = vld [vmem:[%s1143_s5 + $0x18] sm:$0xff] }
  0x4e   : > { %526 = vmatprep.subr.mxu0 %v469_v39  ;;  %597 = vmatprep.subr.mxu1 %v471_v40  ;;  %v444_v1 = vld [vmem:[%s1143_s5] sm:$0xff]  ;;  %v446_v2 = vld [vmem:[%s1143_s5 + $0x10] sm:$0xff] }
  0x4f   : > { %527 = vmatpush1.msra.mxu0 %v468_v41  ;;  %598 = vmatpush1.msra.mxu1 %v470_v42  ;;  %v443_v3 = vld [vmem:[%s1231_s0] sm:$0xff] }
  0x50   : > { %528 = vmatprep.subr.mxu0 %v465_v43  ;;  %599 = vmatprep.subr.mxu1 %v467_v44 }
  0x51   : > { %529 = vmatpush1.msra.mxu0 %v464_v45  ;;  %600 = vmatpush1.msra.mxu1 %v466_v46 }
  0x52   : > { %530 = vmatprep.subr.mxu0 %v461_v47  ;;  %601 = vmatprep.subr.mxu1 %v463_v48 }
  0x53   : > { %531 = vmatpush1.msra.mxu0 %v460_v49  ;;  %602 = vmatpush1.msra.mxu1 %v462_v50 }
  0x54   : > { %532 = vmatprep.subr.mxu0 %v457_v51  ;;  %603 = vmatprep.subr.mxu1 %v459_v52 }
  0x55   : > { %533 = vmatpush1.msra.mxu0 %v456_v53  ;;  %604 = vmatpush1.msra.mxu1 %v458_v54 }
  0x56   : > { %534 = vmatprep.subr.mxu0 %v453_v55  ;;  %605 = vmatprep.subr.mxu1 %v455_v56 }
  0x57   : > { %535 = vmatpush1.msra.mxu0 %v452_v57  ;;  %606 = vmatpush1.msra.mxu1 %v454_v58 }
  0x58   : > { %536 = vmatprep.subr.mxu0 %v449_v59  ;;  %607 = vmatprep.subr.mxu1 %v451_v60 }
  0x59   : > { %537 = vmatpush1.msra.mxu0 %v448_v61  ;;  %608 = vmatpush1.msra.mxu1 %v450_v62 }
  0x5a   : > { %538 = vmatprep.subr.mxu0 %v445_v63  ;;  %609 = vmatprep.subr.mxu1 %v447_v0 }
  0x5b   : > { %539 = vmatpush1.msra.mxu0 %v444_v1  ;;  %610 = vmatpush1.msra.mxu1 %v446_v2 }
  0x5c   : > { %573 = vmatmul.mubr.f32.vlgmr.msra.gmra.mxu0 %v443_v3  ;;  %644 = vmatmul.mubr.f32.vlgmr.msra.gmra.mxu1 %v443_v3 }
  0xb7   : > { %v669_v4 = vpop.permute.xlu0 %668 }
 0x11c   : > { %v574_v5 = vpop.f32.mrf.mxu0  ;;  %v645_v6 = vpop.f32.mrf.mxu1 }
 0x11d   : > { %v671_v7 = vadd.f32 %v669_v4, %v574_v5  ;;  %v673_v8 = vadd.f32 %v669_v4, %v645_v6 }
 0x11e   : > { %v576_v9 = vpop.f32.mrf.mxu0  ;;  %v647_v10 = vpop.f32.mrf.mxu1 }
 0x11f   : > { %vm675_vm0 = vcmp.gt.f32.partialorder %v671_v7, 0.0  ;;  %v679_v11 = vmul.f32 0.2, %v671_v7  ;;  %vm677_vm1 = vcmp.gt.f32.partialorder %v673_v8, 0.0  ;;  %v681_v12 = vmul.f32 0.2, %v673_v8 }
 0x120   : > { %v672_v13 = vadd.f32 %v669_v4, %v576_v9  ;;  %v674_v14 = vadd.f32 %v669_v4, %v647_v10 }
 0x121   : > { %v683_v15 = vsel %vm675_vm0, %v671_v7, %v679_v11  ;;  %v685_v16 = vsel %vm677_vm1, %v673_v8, %v681_v12 }
 0x122   : > { %687 = vst [vmem:[%s429_s12] sm:$0xff] %v683_v15  ;;  %689 = vst [vmem:[%s429_s12 + $0x10] sm:$0xff] %v685_v16  ;;  %vm676_vm2 = vcmp.gt.f32.partialorder %v672_v13, 0.0  ;;  %v680_v17 = vmul.f32 0.2, %v672_v13  ;;  %vm678_vm3 = vcmp.gt.f32.partialorder %v674_v14, 0.0 }
 0x123   : > { %v682_v18 = vmul.f32 0.2, %v674_v14 }
 0x124   : > { %v684_v19 = vsel %vm676_vm2, %v672_v13, %v680_v17 }
 0x125   : > { %v686_v20 = vsel %vm678_vm3, %v674_v14, %v682_v18  ;;  %688 = vst [vmem:[%s429_s12 + $0x8] sm:$0xff] %v684_v19 }
 0x126   : > { %690 = vst [vmem:[%s429_s12 + $0x18] sm:$0xff] %v686_v20 }
 0x127 PF: > { %s13_s16 = sadd.s32 1, %s938_s16   ;;  %s1235_s12 = smov %s926_s13 }
 0x128   : > { %p10_p10 = scmp.ge.s32.totalorder %s13_s16, 18   ;;  %s1236_s13 = smov %s997_s20 }
 0x129   : > { %s1237_s14 = smov %s934_s15  ;;  %s1238_s15 = smov %s1240_s17 }
 0x12a   :  { %12 = sbr.rel (!%p10_p10) target bundleno = 3 (0x3), region = 104 }

// kernel: squeeze.515
= control target key start
LH: loop header
LB: loop body
LE: loop exit
PB: predicated region body
PF: predicated region fallthrough
CT: control target
= control target key end

     0   :  { %vm4_vm0 = vcmask 130048   ;;  %s649_s12 = smov 112   ;;  %s910_s0 = inlined_call_operand.vmem [shape: f32[8192], index: 0, kind: input, shape index: {}]   ;;  %s911_s1 = inlined_call_operand.hbm [shape: f32[2,1,16,16,16], index: 1, kind: output, shape index: {}]  }
   0x1   :  { %v670_v0 = vld [vmem:[%s910_s0 + $0x10] sm:$0xff]   ;;  %v675_v1 = vld [vmem:[%s910_s0] sm:$0xff]   ;;  %v680_v2 = vld [vmem:[%s910_s0 + $0x18] sm:$0xff]  }
   0x2   :  { %75 = vrot.lane.b32.xlu1 %v670_v0, %s649_s12  ;;  %57 = vrot.lane.b32.xlu0 %v675_v1, %s649_s12  ;;  %v687_v3 = vld [vmem:[%s910_s0 + $0x8] sm:$0xff]   ;;  %5 = vst.msk [vmem:[#allocation0] ss:$8 sm:$0xf] %vm4_vm0, %v675_v1   ;;  %v709_v5 = vld [vmem:[%s910_s0 + $0x20] sm:$0xff]  }
   0x3   :  { %v692_v4 = vld [vmem:[%s910_s0 + $0x28] sm:$0xff]   ;;  %6 = vst.msk [vmem:[#allocation0] ss:$8 sm:$0xf0] %vm4_vm0, %v675_v1   ;;  %v714_v6 = vld [vmem:[%s910_s0 + $0x38] sm:$0xff]   ;;  %v719_v7 = vld [vmem:[%s910_s0 + $0x30] sm:$0xff]  }
   0x4   :  { %18 = vst.msk [vmem:[#allocation0 + $0x80] ss:$8 sm:$0xf] %vm4_vm0, %v670_v0   ;;  %20 = vst.msk [vmem:[#allocation0 + $0x80] ss:$8 sm:$0xf0] %vm4_vm0, %v670_v0  }
   0x5   :  { %25 = vst.msk [vmem:[#allocation0 + $0xc0] ss:$8 sm:$0xf] %vm4_vm0, %v680_v2   ;;  %27 = vst.msk [vmem:[#allocation0 + $0xc0] ss:$8 sm:$0xf0] %vm4_vm0, %v680_v2  }
   0x6   :  { %11 = vst.msk [vmem:[#allocation0 + $0x40] ss:$8 sm:$0xf] %vm4_vm0, %v687_v3   ;;  %13 = vst.msk [vmem:[#allocation0 + $0x40] ss:$8 sm:$0xf0] %vm4_vm0, %v687_v3  }
   0x7   :  { %39 = vst.msk [vmem:[#allocation0 + $0x140] ss:$8 sm:$0xf] %vm4_vm0, %v692_v4   ;;  %41 = vst.msk [vmem:[#allocation0 + $0x140] ss:$8 sm:$0xf0] %vm4_vm0, %v692_v4  }
   0x8   :  { %2 = vsyncpa [#allocation1], 0  ;;  %32 = vst.msk [vmem:[#allocation0 + $0x100] ss:$8 sm:$0xf] %vm4_vm0, %v709_v5   ;;  %84 = vrot.lane.b32.xlu1 %v680_v2, %s649_s12  ;;  %66 = vrot.lane.b32.xlu0 %v687_v3, %s649_s12  ;;  %s650_s0 = smov 96  }
   0x9   :  { %34 = vst.msk [vmem:[#allocation0 + $0x100] ss:$8 sm:$0xf0] %vm4_vm0, %v709_v5   ;;  %46 = vst.msk [vmem:[#allocation0 + $0x180] ss:$8 sm:$0xf] %vm4_vm0, %v719_v7  }
   0xa   :  { %48 = vst.msk [vmem:[#allocation0 + $0x180] ss:$8 sm:$0xf0] %vm4_vm0, %v719_v7   ;;  %53 = vst.msk [vmem:[#allocation0 + $0x1c0] ss:$8 sm:$0xf] %vm4_vm0, %v714_v6  }
   0xb   :  { %55 = vst.msk [vmem:[#allocation0 + $0x1c0] ss:$8 sm:$0xf0] %vm4_vm0, %v714_v6   ;;  %s651_s23 = smov 80   ;;  %s652_s24 = smov 64  }
   0xc   :  { %102 = vrot.lane.b32.xlu1 %v692_v4, %s649_s12  ;;  %93 = vrot.lane.b32.xlu0 %v709_v5, %s649_s12  ;;  %s653_s25 = smov 48   ;;  %s654_s26 = smov 32  }
   0xd   :  { %s655_s27 = smov 16   ;;  %s656_s28 = smov [#allocation0]  }
   0xe   :  { %s557_s29 = sshll.u32 %s656_s28, 4  ;;  %s558_s29 = int_to_ptr.vmem [resolvable:$true] %s557_s29 }
   0xf   :  { %s627_s30 = scalar_lea.vmem %s558_s29, 8192  ;;  %p632_p1 = scmp.lt.s32.totalorder %s558_s29, %s558_s29 }
  0x10   :  { %120 = vrot.lane.b32.xlu1 %v714_v6, %s649_s12  ;;  %111 = vrot.lane.b32.xlu0 %v719_v7, %s649_s12  ;;  %p628_p0 = scmp.ne.s32.totalorder %s558_s29, %s627_s30  ;;  %p633_p2 = scmp.lt.s32.totalorder %s627_s30, %s627_s30 }
  0x12   :  { %p634_p3 = por %p633_p2, %p632_p1 }
  0x14   :  { %137 = vrot.lane.b32.xlu1 %v687_v3, %s650_s0  ;;  %128 = vrot.lane.b32.xlu0 %v675_v1, %s650_s0  ;;  %p635_p4 = pnand %p634_p3, %p628_p0 }
  0x18   :  { %155 = vrot.lane.b32.xlu1 %v680_v2, %s650_s0  ;;  %146 = vrot.lane.b32.xlu0 %v670_v0, %s650_s0 }
  0x1c   :  { %173 = vrot.lane.b32.xlu1 %v692_v4, %s650_s0  ;;  %164 = vrot.lane.b32.xlu0 %v709_v5, %s650_s0 }
  0x20   :  { %191 = vrot.lane.b32.xlu1 %v714_v6, %s650_s0  ;;  %182 = vrot.lane.b32.xlu0 %v719_v7, %s650_s0 }
  0x24   :  { %208 = vrot.lane.b32.xlu1 %v687_v3, %s651_s23  ;;  %199 = vrot.lane.b32.xlu0 %v675_v1, %s651_s23 }
  0x28   :  { %226 = vrot.lane.b32.xlu1 %v680_v2, %s651_s23  ;;  %217 = vrot.lane.b32.xlu0 %v670_v0, %s651_s23 }
  0x2c   :  { %244 = vrot.lane.b32.xlu1 %v692_v4, %s651_s23  ;;  %235 = vrot.lane.b32.xlu0 %v709_v5, %s651_s23 }
  0x30   :  { %262 = vrot.lane.b32.xlu1 %v714_v6, %s651_s23  ;;  %253 = vrot.lane.b32.xlu0 %v719_v7, %s651_s23 }
  0x34   :  { %279 = vrot.lane.b32.xlu1 %v687_v3, %s652_s24  ;;  %270 = vrot.lane.b32.xlu0 %v675_v1, %s652_s24 }
  0x38   :  { %297 = vrot.lane.b32.xlu1 %v680_v2, %s652_s24  ;;  %288 = vrot.lane.b32.xlu0 %v670_v0, %s652_s24 }
  0x3c   :  { %315 = vrot.lane.b32.xlu1 %v692_v4, %s652_s24  ;;  %306 = vrot.lane.b32.xlu0 %v709_v5, %s652_s24 }
  0x40   :  { %333 = vrot.lane.b32.xlu1 %v714_v6, %s652_s24  ;;  %324 = vrot.lane.b32.xlu0 %v719_v7, %s652_s24 }
  0x44   :  { %350 = vrot.lane.b32.xlu1 %v687_v3, %s653_s25  ;;  %341 = vrot.lane.b32.xlu0 %v675_v1, %s653_s25 }
  0x48   :  { %368 = vrot.lane.b32.xlu1 %v680_v2, %s653_s25  ;;  %359 = vrot.lane.b32.xlu0 %v670_v0, %s653_s25 }
  0x4c   :  { %386 = vrot.lane.b32.xlu1 %v692_v4, %s653_s25  ;;  %377 = vrot.lane.b32.xlu0 %v709_v5, %s653_s25 }
  0x50   :  { %404 = vrot.lane.b32.xlu1 %v714_v6, %s653_s25  ;;  %395 = vrot.lane.b32.xlu0 %v719_v7, %s653_s25 }
  0x54   :  { %421 = vrot.lane.b32.xlu1 %v687_v3, %s654_s26  ;;  %412 = vrot.lane.b32.xlu0 %v675_v1, %s654_s26 }
  0x58   :  { %439 = vrot.lane.b32.xlu1 %v680_v2, %s654_s26  ;;  %430 = vrot.lane.b32.xlu0 %v670_v0, %s654_s26 }
  0x5c   :  { %457 = vrot.lane.b32.xlu1 %v692_v4, %s654_s26  ;;  %448 = vrot.lane.b32.xlu0 %v709_v5, %s654_s26 }
  0x60   :  { %475 = vrot.lane.b32.xlu1 %v714_v6, %s654_s26  ;;  %466 = vrot.lane.b32.xlu0 %v719_v7, %s654_s26 }
  0x64   :  { %492 = vrot.lane.b32.xlu1 %v687_v3, %s655_s27  ;;  %483 = vrot.lane.b32.xlu0 %v675_v1, %s655_s27 }
  0x68   :  { %510 = vrot.lane.b32.xlu1 %v680_v2, %s655_s27  ;;  %501 = vrot.lane.b32.xlu0 %v670_v0, %s655_s27 }
  0x6c   :  { %528 = vrot.lane.b32.xlu1 %v692_v4, %s655_s27  ;;  %519 = vrot.lane.b32.xlu0 %v709_v5, %s655_s27 }
  0x70   :  { %546 = vrot.lane.b32.xlu1 %v714_v6, %s655_s27  ;;  %537 = vrot.lane.b32.xlu0 %v719_v7, %s655_s27 }
  0x74   :  { %v76_v8 = vpop.permute.xlu1 %75   ;;  %v58_v9 = vpop.permute.xlu0 %57  }
  0x75   :  { %79 = vst.msk [vmem:[#allocation0 + $0x81] ss:$8 sm:$0xf] %vm4_vm0, %v76_v8   ;;  %81 = vst.msk [vmem:[#allocation0 + $0x81] ss:$8 sm:$0xf0] %vm4_vm0, %v76_v8  }
  0x76   :  { %61 = vst.msk [vmem:[#allocation0 + $0x1] ss:$8 sm:$0xf] %vm4_vm0, %v58_v9   ;;  %63 = vst.msk [vmem:[#allocation0 + $0x1] ss:$8 sm:$0xf0] %vm4_vm0, %v58_v9  }
  0x7a   :  { %v85_v10 = vpop.permute.xlu1 %84   ;;  %v67_v11 = vpop.permute.xlu0 %66  }
  0x7b   :  { %88 = vst.msk [vmem:[#allocation0 + $0xc1] ss:$8 sm:$0xf] %vm4_vm0, %v85_v10   ;;  %90 = vst.msk [vmem:[#allocation0 + $0xc1] ss:$8 sm:$0xf0] %vm4_vm0, %v85_v10  }
  0x7c   :  { %70 = vst.msk [vmem:[#allocation0 + $0x41] ss:$8 sm:$0xf] %vm4_vm0, %v67_v11   ;;  %72 = vst.msk [vmem:[#allocation0 + $0x41] ss:$8 sm:$0xf0] %vm4_vm0, %v67_v11  }
  0x7e   :  { %v103_v12 = vpop.permute.xlu1 %102   ;;  %v94_v13 = vpop.permute.xlu0 %93  }
  0x7f   :  { %106 = vst.msk [vmem:[#allocation0 + $0x141] ss:$8 sm:$0xf] %vm4_vm0, %v103_v12   ;;  %108 = vst.msk [vmem:[#allocation0 + $0x141] ss:$8 sm:$0xf0] %vm4_vm0, %v103_v12  }
  0x80   :  { %97 = vst.msk [vmem:[#allocation0 + $0x101] ss:$8 sm:$0xf] %vm4_vm0, %v94_v13   ;;  %99 = vst.msk [vmem:[#allocation0 + $0x101] ss:$8 sm:$0xf0] %vm4_vm0, %v94_v13  }
  0x82   :  { %v121_v14 = vpop.permute.xlu1 %120   ;;  %v112_v15 = vpop.permute.xlu0 %111  }
  0x83   :  { %124 = vst.msk [vmem:[#allocation0 + $0x1c1] ss:$8 sm:$0xf] %vm4_vm0, %v121_v14   ;;  %126 = vst.msk [vmem:[#allocation0 + $0x1c1] ss:$8 sm:$0xf0] %vm4_vm0, %v121_v14  }
  0x84   :  { %115 = vst.msk [vmem:[#allocation0 + $0x181] ss:$8 sm:$0xf] %vm4_vm0, %v112_v15   ;;  %117 = vst.msk [vmem:[#allocation0 + $0x181] ss:$8 sm:$0xf0] %vm4_vm0, %v112_v15  }
  0x86   :  { %v138_v16 = vpop.permute.xlu1 %137   ;;  %v129_v17 = vpop.permute.xlu0 %128  }
  0x87   :  { %141 = vst.msk [vmem:[#allocation0 + $0x42] ss:$8 sm:$0xf] %vm4_vm0, %v138_v16   ;;  %143 = vst.msk [vmem:[#allocation0 + $0x42] ss:$8 sm:$0xf0] %vm4_vm0, %v138_v16  }
  0x88   :  { %132 = vst.msk [vmem:[#allocation0 + $0x2] ss:$8 sm:$0xf] %vm4_vm0, %v129_v17   ;;  %134 = vst.msk [vmem:[#allocation0 + $0x2] ss:$8 sm:$0xf0] %vm4_vm0, %v129_v17  }
  0x8a   :  { %v156_v18 = vpop.permute.xlu1 %155   ;;  %v147_v19 = vpop.permute.xlu0 %146  }
  0x8b   :  { %159 = vst.msk [vmem:[#allocation0 + $0xc2] ss:$8 sm:$0xf] %vm4_vm0, %v156_v18   ;;  %161 = vst.msk [vmem:[#allocation0 + $0xc2] ss:$8 sm:$0xf0] %vm4_vm0, %v156_v18  }
  0x8c   :  { %150 = vst.msk [vmem:[#allocation0 + $0x82] ss:$8 sm:$0xf] %vm4_vm0, %v147_v19   ;;  %152 = vst.msk [vmem:[#allocation0 + $0x82] ss:$8 sm:$0xf0] %vm4_vm0, %v147_v19  }
  0x8e   :  { %v174_v20 = vpop.permute.xlu1 %173   ;;  %v165_v21 = vpop.permute.xlu0 %164  }
  0x8f   :  { %177 = vst.msk [vmem:[#allocation0 + $0x142] ss:$8 sm:$0xf] %vm4_vm0, %v174_v20   ;;  %179 = vst.msk [vmem:[#allocation0 + $0x142] ss:$8 sm:$0xf0] %vm4_vm0, %v174_v20  }
  0x90   :  { %168 = vst.msk [vmem:[#allocation0 + $0x102] ss:$8 sm:$0xf] %vm4_vm0, %v165_v21   ;;  %170 = vst.msk [vmem:[#allocation0 + $0x102] ss:$8 sm:$0xf0] %vm4_vm0, %v165_v21  }
  0x92   :  { %v192_v22 = vpop.permute.xlu1 %191   ;;  %v183_v23 = vpop.permute.xlu0 %182  }
  0x93   :  { %195 = vst.msk [vmem:[#allocation0 + $0x1c2] ss:$8 sm:$0xf] %vm4_vm0, %v192_v22   ;;  %197 = vst.msk [vmem:[#allocation0 + $0x1c2] ss:$8 sm:$0xf0] %vm4_vm0, %v192_v22  }
  0x94   :  { %186 = vst.msk [vmem:[#allocation0 + $0x182] ss:$8 sm:$0xf] %vm4_vm0, %v183_v23   ;;  %188 = vst.msk [vmem:[#allocation0 + $0x182] ss:$8 sm:$0xf0] %vm4_vm0, %v183_v23  }
  0x96   :  { %v209_v24 = vpop.permute.xlu1 %208   ;;  %v200_v25 = vpop.permute.xlu0 %199  }
  0x97   :  { %212 = vst.msk [vmem:[#allocation0 + $0x43] ss:$8 sm:$0xf] %vm4_vm0, %v209_v24   ;;  %214 = vst.msk [vmem:[#allocation0 + $0x43] ss:$8 sm:$0xf0] %vm4_vm0, %v209_v24  }
  0x98   :  { %203 = vst.msk [vmem:[#allocation0 + $0x3] ss:$8 sm:$0xf] %vm4_vm0, %v200_v25   ;;  %205 = vst.msk [vmem:[#allocation0 + $0x3] ss:$8 sm:$0xf0] %vm4_vm0, %v200_v25  }
  0x9a   :  { %v227_v26 = vpop.permute.xlu1 %226   ;;  %v218_v27 = vpop.permute.xlu0 %217  }
  0x9b   :  { %230 = vst.msk [vmem:[#allocation0 + $0xc3] ss:$8 sm:$0xf] %vm4_vm0, %v227_v26   ;;  %232 = vst.msk [vmem:[#allocation0 + $0xc3] ss:$8 sm:$0xf0] %vm4_vm0, %v227_v26  }
  0x9c   :  { %221 = vst.msk [vmem:[#allocation0 + $0x83] ss:$8 sm:$0xf] %vm4_vm0, %v218_v27   ;;  %223 = vst.msk [vmem:[#allocation0 + $0x83] ss:$8 sm:$0xf0] %vm4_vm0, %v218_v27  }
  0x9e   :  { %v245_v28 = vpop.permute.xlu1 %244   ;;  %v236_v29 = vpop.permute.xlu0 %235  }
  0x9f   :  { %248 = vst.msk [vmem:[#allocation0 + $0x143] ss:$8 sm:$0xf] %vm4_vm0, %v245_v28   ;;  %250 = vst.msk [vmem:[#allocation0 + $0x143] ss:$8 sm:$0xf0] %vm4_vm0, %v245_v28  }
  0xa0   :  { %239 = vst.msk [vmem:[#allocation0 + $0x103] ss:$8 sm:$0xf] %vm4_vm0, %v236_v29   ;;  %241 = vst.msk [vmem:[#allocation0 + $0x103] ss:$8 sm:$0xf0] %vm4_vm0, %v236_v29  }
  0xa2   :  { %v263_v30 = vpop.permute.xlu1 %262   ;;  %v254_v31 = vpop.permute.xlu0 %253  }
  0xa3   :  { %266 = vst.msk [vmem:[#allocation0 + $0x1c3] ss:$8 sm:$0xf] %vm4_vm0, %v263_v30   ;;  %268 = vst.msk [vmem:[#allocation0 + $0x1c3] ss:$8 sm:$0xf0] %vm4_vm0, %v263_v30  }
  0xa4   :  { %257 = vst.msk [vmem:[#allocation0 + $0x183] ss:$8 sm:$0xf] %vm4_vm0, %v254_v31   ;;  %259 = vst.msk [vmem:[#allocation0 + $0x183] ss:$8 sm:$0xf0] %vm4_vm0, %v254_v31  }
  0xa6   :  { %v280_v32 = vpop.permute.xlu1 %279   ;;  %v271_v33 = vpop.permute.xlu0 %270  }
  0xa7   :  { %283 = vst.msk [vmem:[#allocation0 + $0x44] ss:$8 sm:$0xf] %vm4_vm0, %v280_v32   ;;  %285 = vst.msk [vmem:[#allocation0 + $0x44] ss:$8 sm:$0xf0] %vm4_vm0, %v280_v32  }
  0xa8   :  { %274 = vst.msk [vmem:[#allocation0 + $0x4] ss:$8 sm:$0xf] %vm4_vm0, %v271_v33   ;;  %276 = vst.msk [vmem:[#allocation0 + $0x4] ss:$8 sm:$0xf0] %vm4_vm0, %v271_v33  }
  0xaa   :  { %v298_v34 = vpop.permute.xlu1 %297   ;;  %v289_v35 = vpop.permute.xlu0 %288  }
  0xab   :  { %301 = vst.msk [vmem:[#allocation0 + $0xc4] ss:$8 sm:$0xf] %vm4_vm0, %v298_v34   ;;  %303 = vst.msk [vmem:[#allocation0 + $0xc4] ss:$8 sm:$0xf0] %vm4_vm0, %v298_v34  }
  0xac   :  { %292 = vst.msk [vmem:[#allocation0 + $0x84] ss:$8 sm:$0xf] %vm4_vm0, %v289_v35   ;;  %294 = vst.msk [vmem:[#allocation0 + $0x84] ss:$8 sm:$0xf0] %vm4_vm0, %v289_v35  }
  0xae   :  { %v316_v36 = vpop.permute.xlu1 %315   ;;  %v307_v37 = vpop.permute.xlu0 %306  }
  0xaf   :  { %319 = vst.msk [vmem:[#allocation0 + $0x144] ss:$8 sm:$0xf] %vm4_vm0, %v316_v36   ;;  %321 = vst.msk [vmem:[#allocation0 + $0x144] ss:$8 sm:$0xf0] %vm4_vm0, %v316_v36  }
  0xb0   :  { %310 = vst.msk [vmem:[#allocation0 + $0x104] ss:$8 sm:$0xf] %vm4_vm0, %v307_v37   ;;  %312 = vst.msk [vmem:[#allocation0 + $0x104] ss:$8 sm:$0xf0] %vm4_vm0, %v307_v37  }
  0xb2   :  { %v334_v38 = vpop.permute.xlu1 %333   ;;  %v325_v39 = vpop.permute.xlu0 %324  }
  0xb3   :  { %337 = vst.msk [vmem:[#allocation0 + $0x1c4] ss:$8 sm:$0xf] %vm4_vm0, %v334_v38   ;;  %339 = vst.msk [vmem:[#allocation0 + $0x1c4] ss:$8 sm:$0xf0] %vm4_vm0, %v334_v38  }
  0xb4   :  { %328 = vst.msk [vmem:[#allocation0 + $0x184] ss:$8 sm:$0xf] %vm4_vm0, %v325_v39   ;;  %330 = vst.msk [vmem:[#allocation0 + $0x184] ss:$8 sm:$0xf0] %vm4_vm0, %v325_v39  }
  0xb6   :  { %v351_v40 = vpop.permute.xlu1 %350   ;;  %v342_v41 = vpop.permute.xlu0 %341  }
  0xb7   :  { %354 = vst.msk [vmem:[#allocation0 + $0x45] ss:$8 sm:$0xf] %vm4_vm0, %v351_v40   ;;  %356 = vst.msk [vmem:[#allocation0 + $0x45] ss:$8 sm:$0xf0] %vm4_vm0, %v351_v40  }
  0xb8   :  { %345 = vst.msk [vmem:[#allocation0 + $0x5] ss:$8 sm:$0xf] %vm4_vm0, %v342_v41   ;;  %347 = vst.msk [vmem:[#allocation0 + $0x5] ss:$8 sm:$0xf0] %vm4_vm0, %v342_v41  }
  0xba   :  { %v369_v42 = vpop.permute.xlu1 %368   ;;  %v360_v43 = vpop.permute.xlu0 %359  }
  0xbb   :  { %372 = vst.msk [vmem:[#allocation0 + $0xc5] ss:$8 sm:$0xf] %vm4_vm0, %v369_v42   ;;  %374 = vst.msk [vmem:[#allocation0 + $0xc5] ss:$8 sm:$0xf0] %vm4_vm0, %v369_v42  }
  0xbc   :  { %363 = vst.msk [vmem:[#allocation0 + $0x85] ss:$8 sm:$0xf] %vm4_vm0, %v360_v43   ;;  %365 = vst.msk [vmem:[#allocation0 + $0x85] ss:$8 sm:$0xf0] %vm4_vm0, %v360_v43  }
  0xbe   :  { %v387_v44 = vpop.permute.xlu1 %386   ;;  %v378_v45 = vpop.permute.xlu0 %377  }
  0xbf   :  { %390 = vst.msk [vmem:[#allocation0 + $0x145] ss:$8 sm:$0xf] %vm4_vm0, %v387_v44   ;;  %392 = vst.msk [vmem:[#allocation0 + $0x145] ss:$8 sm:$0xf0] %vm4_vm0, %v387_v44  }
  0xc0   :  { %381 = vst.msk [vmem:[#allocation0 + $0x105] ss:$8 sm:$0xf] %vm4_vm0, %v378_v45   ;;  %383 = vst.msk [vmem:[#allocation0 + $0x105] ss:$8 sm:$0xf0] %vm4_vm0, %v378_v45  }
  0xc2   :  { %v405_v46 = vpop.permute.xlu1 %404   ;;  %v396_v47 = vpop.permute.xlu0 %395  }
  0xc3   :  { %408 = vst.msk [vmem:[#allocation0 + $0x1c5] ss:$8 sm:$0xf] %vm4_vm0, %v405_v46   ;;  %410 = vst.msk [vmem:[#allocation0 + $0x1c5] ss:$8 sm:$0xf0] %vm4_vm0, %v405_v46  }
  0xc4   :  { %399 = vst.msk [vmem:[#allocation0 + $0x185] ss:$8 sm:$0xf] %vm4_vm0, %v396_v47   ;;  %401 = vst.msk [vmem:[#allocation0 + $0x185] ss:$8 sm:$0xf0] %vm4_vm0, %v396_v47  }
  0xc6   :  { %v422_v48 = vpop.permute.xlu1 %421   ;;  %v413_v49 = vpop.permute.xlu0 %412  }
  0xc7   :  { %425 = vst.msk [vmem:[#allocation0 + $0x46] ss:$8 sm:$0xf] %vm4_vm0, %v422_v48   ;;  %427 = vst.msk [vmem:[#allocation0 + $0x46] ss:$8 sm:$0xf0] %vm4_vm0, %v422_v48  }
  0xc8   :  { %416 = vst.msk [vmem:[#allocation0 + $0x6] ss:$8 sm:$0xf] %vm4_vm0, %v413_v49   ;;  %418 = vst.msk [vmem:[#allocation0 + $0x6] ss:$8 sm:$0xf0] %vm4_vm0, %v413_v49  }
  0xca   :  { %v440_v50 = vpop.permute.xlu1 %439   ;;  %v431_v51 = vpop.permute.xlu0 %430  }
  0xcb   :  { %443 = vst.msk [vmem:[#allocation0 + $0xc6] ss:$8 sm:$0xf] %vm4_vm0, %v440_v50   ;;  %445 = vst.msk [vmem:[#allocation0 + $0xc6] ss:$8 sm:$0xf0] %vm4_vm0, %v440_v50  }
  0xcc   :  { %434 = vst.msk [vmem:[#allocation0 + $0x86] ss:$8 sm:$0xf] %vm4_vm0, %v431_v51   ;;  %436 = vst.msk [vmem:[#allocation0 + $0x86] ss:$8 sm:$0xf0] %vm4_vm0, %v431_v51  }
  0xce   :  { %v458_v52 = vpop.permute.xlu1 %457   ;;  %v449_v53 = vpop.permute.xlu0 %448  }
  0xcf   :  { %461 = vst.msk [vmem:[#allocation0 + $0x146] ss:$8 sm:$0xf] %vm4_vm0, %v458_v52   ;;  %463 = vst.msk [vmem:[#allocation0 + $0x146] ss:$8 sm:$0xf0] %vm4_vm0, %v458_v52  }
  0xd0   :  { %452 = vst.msk [vmem:[#allocation0 + $0x106] ss:$8 sm:$0xf] %vm4_vm0, %v449_v53   ;;  %454 = vst.msk [vmem:[#allocation0 + $0x106] ss:$8 sm:$0xf0] %vm4_vm0, %v449_v53  }
  0xd2   :  { %v476_v54 = vpop.permute.xlu1 %475   ;;  %v467_v55 = vpop.permute.xlu0 %466  }
  0xd3   :  { %479 = vst.msk [vmem:[#allocation0 + $0x1c6] ss:$8 sm:$0xf] %vm4_vm0, %v476_v54   ;;  %481 = vst.msk [vmem:[#allocation0 + $0x1c6] ss:$8 sm:$0xf0] %vm4_vm0, %v476_v54  }
  0xd4   :  { %470 = vst.msk [vmem:[#allocation0 + $0x186] ss:$8 sm:$0xf] %vm4_vm0, %v467_v55   ;;  %472 = vst.msk [vmem:[#allocation0 + $0x186] ss:$8 sm:$0xf0] %vm4_vm0, %v467_v55  }
  0xd6   :  { %v493_v56 = vpop.permute.xlu1 %492   ;;  %v484_v57 = vpop.permute.xlu0 %483  }
  0xd7   :  { %496 = vst.msk [vmem:[#allocation0 + $0x47] ss:$8 sm:$0xf] %vm4_vm0, %v493_v56   ;;  %498 = vst.msk [vmem:[#allocation0 + $0x47] ss:$8 sm:$0xf0] %vm4_vm0, %v493_v56  }
  0xd8   :  { %487 = vst.msk [vmem:[#allocation0 + $0x7] ss:$8 sm:$0xf] %vm4_vm0, %v484_v57   ;;  %489 = vst.msk [vmem:[#allocation0 + $0x7] ss:$8 sm:$0xf0] %vm4_vm0, %v484_v57  }
  0xda   :  { %v511_v58 = vpop.permute.xlu1 %510   ;;  %v502_v59 = vpop.permute.xlu0 %501  }
  0xdb   :  { %514 = vst.msk [vmem:[#allocation0 + $0xc7] ss:$8 sm:$0xf] %vm4_vm0, %v511_v58   ;;  %516 = vst.msk [vmem:[#allocation0 + $0xc7] ss:$8 sm:$0xf0] %vm4_vm0, %v511_v58  }
  0xdc   :  { %505 = vst.msk [vmem:[#allocation0 + $0x87] ss:$8 sm:$0xf] %vm4_vm0, %v502_v59   ;;  %507 = vst.msk [vmem:[#allocation0 + $0x87] ss:$8 sm:$0xf0] %vm4_vm0, %v502_v59  }
  0xde   :  { %v529_v60 = vpop.permute.xlu1 %528   ;;  %v520_v61 = vpop.permute.xlu0 %519  }
  0xdf   :  { %532 = vst.msk [vmem:[#allocation0 + $0x147] ss:$8 sm:$0xf] %vm4_vm0, %v529_v60   ;;  %534 = vst.msk [vmem:[#allocation0 + $0x147] ss:$8 sm:$0xf0] %vm4_vm0, %v529_v60  }
  0xe0   :  { %523 = vst.msk [vmem:[#allocation0 + $0x107] ss:$8 sm:$0xf] %vm4_vm0, %v520_v61   ;;  %525 = vst.msk [vmem:[#allocation0 + $0x107] ss:$8 sm:$0xf0] %vm4_vm0, %v520_v61  }
  0xe2   :  { %v547_v62 = vpop.permute.xlu1 %546   ;;  %v538_v63 = vpop.permute.xlu0 %537  }
  0xe3   :  { %550 = vst.msk [vmem:[#allocation0 + $0x1c7] ss:$8 sm:$0xf] %vm4_vm0, %v547_v62   ;;  %552 = vst.msk [vmem:[#allocation0 + $0x1c7] ss:$8 sm:$0xf0] %vm4_vm0, %v547_v62  }
  0xe4   :  { %541 = vst.msk [vmem:[#allocation0 + $0x187] ss:$8 sm:$0xf] %vm4_vm0, %v538_v63   ;;  %543 = vst.msk [vmem:[#allocation0 + $0x187] ss:$8 sm:$0xf0] %vm4_vm0, %v538_v63  }
  0xe5   :  { %638 = shalt.err (!%p635_p4)
}
  0xe6   :  { %560 = dma.vmem_to_hbm [thread:$0]  %s558_s29, 8192, %s911_s1, [#allocation1]  }
  0xe7   :  { %647 = dma.done.wait [#allocation1], 8192  }
  0xe8   :  { %648 = vsyncadd [#allocation1], 4294959104 }
  0xe9   :  { %562 = vsyncpa [#allocation1], 1 }

// kernel: decoder_forward.13
= control target key start
LH: loop header
LB: loop body
LE: loop exit
PB: predicated region body
PF: predicated region fallthrough
CT: control target
= control target key end

     0   :  { %s994_s12 = smov 0   ;;  %s996_s13 = smov 0   ;;  %s1263_s0 = inlined_call_operand.vmem [shape: f32[1,8,128], index: 0, kind: input, shape index: {}]   ;;  %s1264_s1 = inlined_call_operand.vmem [shape: f32[1,128,8192], index: 1, kind: input, shape index: {}]   ;;  %s1265_s2 = inlined_call_operand.vmem [shape: f32[8,1], index: 2, kind: input, shape index: {}]   ;;  %s1266_s3 = inlined_call_operand.vmem [shape: f32[1,8,8192], index: 3, kind: output, shape index: {}]  }
   0x1   :  { %s998_s14 = smov 0   ;;  %s1000_s15 = smov 0  }
   0x2   :  { %s1002_s16 = smov 0  }
   0x3 LB: > { %s31_s17 = sadd.s32 1, %s966_s15  ;;  %p87_p1 = scmp.ne.s32.totalorder %s958_s13, %s954_s12  ;;  %s970_s16 = sphi %s1002_s16, %s13_s16   ;;  %s966_s15 = sphi %s1000_s15, %s1270_s15   ;;  %s962_s14 = sphi %s998_s14, %s1269_s14   ;;  %s958_s13 = sphi %s996_s13, %s1268_s13   ;;  %s954_s12 = sphi %s994_s12, %s1267_s12  }
   0x4   : > { %p33_p0 = scmp.ge.s32.totalorder %s31_s17, 16  ;;  %p88_p2 = scmp.eq.s32.totalorder %s970_s16, 0 }
   0x5   : > { %s80_s19 = sadd.s32 1, %s958_s13  ;;  %p858_p5 = scmp.ge.s32.totalorder %s970_s16, 16 }
   0x6   : > { %s1272_s17 = smov (%p33_p0, %s31_s17), 0  ;;  %p89_p3 = por %p88_p2, %p87_p1 }
   0x7   : > { %s76_s18 = ssub.s32 %s966_s15, %s1272_s17  ;;  %189 = sbr.rel (%p858_p5) target bundleno = 48 (0x30), region = 24 }
   0x8   : > { %p78_p4 = scmp.eq.s32.totalorder %s76_s18, 0 }
   0xa   : > { %s1029_s20 = scalar_select %p78_p4, %s958_s13, %s80_s19  }
   0xc   : > { %192 = sbr.rel (!%p89_p3) target bundleno = 48 (0x30), region = 28  ;;  %s194_s21 = sand.u32 (%p89_p3), 1, %s958_s13  }
   0xd   : > { %s872_s22 = sshll.u32 (%p89_p3), %s966_s15, 5  ;;  %s859_s23 = sshll.u32 (%p89_p3), %s194_s21, 9 }
   0xe   : > { %s1037_s26 = scalar_lea.vmem (%p89_p3), %s1264_s1, %s872_s22  ;;  %s1042_s27 = scalar_lea.vmem (%p89_p3), [#allocation3], %s859_s23 }
   0xf   : > { %v217_v0 = vld [vmem:[%s1037_s26] sm:$0xff] (%p89_p3)  ;;  %v219_v1 = vld [vmem:[%s1037_s26 + $0x8] sm:$0xff] (%p89_p3)  ;;  %v221_v2 = vld [vmem:[%s1037_s26 + $0x10] sm:$0xff] (%p89_p3) }
  0x10   : > { %218 = vst [vmem:[%s1042_s27] sm:$0xff] (%p89_p3), %v217_v0  ;;  %220 = vst [vmem:[%s1042_s27 + $0x8] sm:$0xff] (%p89_p3), %v219_v1  ;;  %v223_v3 = vld [vmem:[%s1037_s26 + $0x18] sm:$0xff] (%p89_p3)  ;;  %v225_v4 = vld [vmem:[%s1037_s26 + $0x200] sm:$0xff] (%p89_p3) }
  0x11   : > { %222 = vst [vmem:[%s1042_s27 + $0x10] sm:$0xff] %v221_v2  ;;  %v227_v5 = vld [vmem:[%s1037_s26 + $0x208] sm:$0xff]  ;;  %224 = vst [vmem:[%s1042_s27 + $0x18] sm:$0xff] %v223_v3  ;;  %v229_v6 = vld [vmem:[%s1037_s26 + $0x210] sm:$0xff] }
  0x12   : > { %226 = vst [vmem:[%s1042_s27 + $0x20] sm:$0xff] %v225_v4  ;;  %228 = vst [vmem:[%s1042_s27 + $0x28] sm:$0xff] %v227_v5  ;;  %v231_v7 = vld [vmem:[%s1037_s26 + $0x218] sm:$0xff]  ;;  %v233_v8 = vld [vmem:[%s1037_s26 + $0x400] sm:$0xff] }
  0x13   : > { %230 = vst [vmem:[%s1042_s27 + $0x30] sm:$0xff] %v229_v6  ;;  %232 = vst [vmem:[%s1042_s27 + $0x38] sm:$0xff] %v231_v7  ;;  %v235_v9 = vld [vmem:[%s1037_s26 + $0x408] sm:$0xff]  ;;  %v237_v10 = vld [vmem:[%s1037_s26 + $0x410] sm:$0xff] }
  0x14   : > { %234 = vst [vmem:[%s1042_s27 + $0x40] sm:$0xff] %v233_v8  ;;  %v239_v11 = vld [vmem:[%s1037_s26 + $0x418] sm:$0xff]  ;;  %236 = vst [vmem:[%s1042_s27 + $0x48] sm:$0xff] %v235_v9  ;;  %v241_v12 = vld [vmem:[%s1037_s26 + $0x600] sm:$0xff] }
  0x15   : > { %238 = vst [vmem:[%s1042_s27 + $0x50] sm:$0xff] %v237_v10  ;;  %240 = vst [vmem:[%s1042_s27 + $0x58] sm:$0xff] %v239_v11  ;;  %v243_v13 = vld [vmem:[%s1037_s26 + $0x608] sm:$0xff]  ;;  %v245_v14 = vld [vmem:[%s1037_s26 + $0x610] sm:$0xff] }
  0x16   : > { %242 = vst [vmem:[%s1042_s27 + $0x60] sm:$0xff] %v241_v12  ;;  %244 = vst [vmem:[%s1042_s27 + $0x68] sm:$0xff] %v243_v13  ;;  %v247_v15 = vld [vmem:[%s1037_s26 + $0x618] sm:$0xff]  ;;  %v249_v16 = vld [vmem:[%s1037_s26 + $0x800] sm:$0xff] }
  0x17   : > { %246 = vst [vmem:[%s1042_s27 + $0x70] sm:$0xff] %v245_v14  ;;  %v251_v17 = vld [vmem:[%s1037_s26 + $0x808] sm:$0xff]  ;;  %248 = vst [vmem:[%s1042_s27 + $0x78] sm:$0xff] %v247_v15  ;;  %v253_v18 = vld [vmem:[%s1037_s26 + $0x810] sm:$0xff] }
  0x18   : > { %250 = vst [vmem:[%s1042_s27 + $0x80] sm:$0xff] %v249_v16  ;;  %252 = vst [vmem:[%s1042_s27 + $0x88] sm:$0xff] %v251_v17  ;;  %v255_v19 = vld [vmem:[%s1037_s26 + $0x818] sm:$0xff]  ;;  %v257_v20 = vld [vmem:[%s1037_s26 + $0xa00] sm:$0xff] }
  0x19   : > { %254 = vst [vmem:[%s1042_s27 + $0x90] sm:$0xff] %v253_v18  ;;  %256 = vst [vmem:[%s1042_s27 + $0x98] sm:$0xff] %v255_v19  ;;  %v259_v21 = vld [vmem:[%s1037_s26 + $0xa08] sm:$0xff]  ;;  %v261_v22 = vld [vmem:[%s1037_s26 + $0xa10] sm:$0xff] }
  0x1a   : > { %258 = vst [vmem:[%s1042_s27 + $0xa0] sm:$0xff] %v257_v20  ;;  %v263_v23 = vld [vmem:[%s1037_s26 + $0xa18] sm:$0xff]  ;;  %260 = vst [vmem:[%s1042_s27 + $0xa8] sm:$0xff] %v259_v21  ;;  %v265_v24 = vld [vmem:[%s1037_s26 + $0xc00] sm:$0xff] }
  0x1b   : > { %262 = vst [vmem:[%s1042_s27 + $0xb0] sm:$0xff] %v261_v22  ;;  %264 = vst [vmem:[%s1042_s27 + $0xb8] sm:$0xff] %v263_v23  ;;  %v267_v25 = vld [vmem:[%s1037_s26 + $0xc08] sm:$0xff]  ;;  %v269_v26 = vld [vmem:[%s1037_s26 + $0xc10] sm:$0xff] }
  0x1c   : > { %266 = vst [vmem:[%s1042_s27 + $0xc0] sm:$0xff] %v265_v24  ;;  %268 = vst [vmem:[%s1042_s27 + $0xc8] sm:$0xff] %v267_v25  ;;  %v271_v27 = vld [vmem:[%s1037_s26 + $0xc18] sm:$0xff]  ;;  %v273_v28 = vld [vmem:[%s1037_s26 + $0xe00] sm:$0xff] }
  0x1d   : > { %270 = vst [vmem:[%s1042_s27 + $0xd0] sm:$0xff] %v269_v26  ;;  %v275_v29 = vld [vmem:[%s1037_s26 + $0xe08] sm:$0xff]  ;;  %272 = vst [vmem:[%s1042_s27 + $0xd8] sm:$0xff] %v271_v27  ;;  %v277_v30 = vld [vmem:[%s1037_s26 + $0xe10] sm:$0xff] }
  0x1e   : > { %274 = vst [vmem:[%s1042_s27 + $0xe0] sm:$0xff] %v273_v28  ;;  %276 = vst [vmem:[%s1042_s27 + $0xe8] sm:$0xff] %v275_v29  ;;  %v279_v31 = vld [vmem:[%s1037_s26 + $0xe18] sm:$0xff]  ;;  %v281_v32 = vld [vmem:[%s1037_s26 + $0x1000] sm:$0xff] }
  0x1f   : > { %278 = vst [vmem:[%s1042_s27 + $0xf0] sm:$0xff] %v277_v30  ;;  %280 = vst [vmem:[%s1042_s27 + $0xf8] sm:$0xff] %v279_v31  ;;  %v283_v33 = vld [vmem:[%s1037_s26 + $0x1008] sm:$0xff]  ;;  %v285_v34 = vld [vmem:[%s1037_s26 + $0x1010] sm:$0xff] }
  0x20   : > { %282 = vst [vmem:[%s1042_s27 + $0x100] sm:$0xff] %v281_v32  ;;  %v287_v35 = vld [vmem:[%s1037_s26 + $0x1018] sm:$0xff]  ;;  %284 = vst [vmem:[%s1042_s27 + $0x108] sm:$0xff] %v283_v33  ;;  %v289_v36 = vld [vmem:[%s1037_s26 + $0x1200] sm:$0xff] }
  0x21   : > { %286 = vst [vmem:[%s1042_s27 + $0x110] sm:$0xff] %v285_v34  ;;  %288 = vst [vmem:[%s1042_s27 + $0x118] sm:$0xff] %v287_v35  ;;  %v291_v37 = vld [vmem:[%s1037_s26 + $0x1208] sm:$0xff]  ;;  %v293_v38 = vld [vmem:[%s1037_s26 + $0x1210] sm:$0xff] }
  0x22   : > { %290 = vst [vmem:[%s1042_s27 + $0x120] sm:$0xff] %v289_v36  ;;  %292 = vst [vmem:[%s1042_s27 + $0x128] sm:$0xff] %v291_v37  ;;  %v295_v39 = vld [vmem:[%s1037_s26 + $0x1218] sm:$0xff]  ;;  %v297_v40 = vld [vmem:[%s1037_s26 + $0x1400] sm:$0xff] }
  0x23   : > { %294 = vst [vmem:[%s1042_s27 + $0x130] sm:$0xff] %v293_v38  ;;  %v299_v41 = vld [vmem:[%s1037_s26 + $0x1408] sm:$0xff]  ;;  %296 = vst [vmem:[%s1042_s27 + $0x138] sm:$0xff] %v295_v39  ;;  %v301_v42 = vld [vmem:[%s1037_s26 + $0x1410] sm:$0xff] }
  0x24   : > { %298 = vst [vmem:[%s1042_s27 + $0x140] sm:$0xff] %v297_v40  ;;  %300 = vst [vmem:[%s1042_s27 + $0x148] sm:$0xff] %v299_v41  ;;  %v303_v43 = vld [vmem:[%s1037_s26 + $0x1418] sm:$0xff]  ;;  %v305_v44 = vld [vmem:[%s1037_s26 + $0x1600] sm:$0xff] }
  0x25   : > { %302 = vst [vmem:[%s1042_s27 + $0x150] sm:$0xff] %v301_v42  ;;  %304 = vst [vmem:[%s1042_s27 + $0x158] sm:$0xff] %v303_v43  ;;  %v307_v45 = vld [vmem:[%s1037_s26 + $0x1608] sm:$0xff]  ;;  %v309_v46 = vld [vmem:[%s1037_s26 + $0x1610] sm:$0xff] }
  0x26   : > { %306 = vst [vmem:[%s1042_s27 + $0x160] sm:$0xff] %v305_v44  ;;  %v311_v47 = vld [vmem:[%s1037_s26 + $0x1618] sm:$0xff]  ;;  %308 = vst [vmem:[%s1042_s27 + $0x168] sm:$0xff] %v307_v45  ;;  %v313_v48 = vld [vmem:[%s1037_s26 + $0x1800] sm:$0xff] }
  0x27   : > { %310 = vst [vmem:[%s1042_s27 + $0x170] sm:$0xff] %v309_v46  ;;  %312 = vst [vmem:[%s1042_s27 + $0x178] sm:$0xff] %v311_v47  ;;  %v315_v49 = vld [vmem:[%s1037_s26 + $0x1808] sm:$0xff]  ;;  %v317_v50 = vld [vmem:[%s1037_s26 + $0x1810] sm:$0xff] }
  0x28   : > { %314 = vst [vmem:[%s1042_s27 + $0x180] sm:$0xff] %v313_v48  ;;  %316 = vst [vmem:[%s1042_s27 + $0x188] sm:$0xff] %v315_v49  ;;  %v319_v51 = vld [vmem:[%s1037_s26 + $0x1818] sm:$0xff]  ;;  %v321_v52 = vld [vmem:[%s1037_s26 + $0x1a00] sm:$0xff] }
  0x29   : > { %318 = vst [vmem:[%s1042_s27 + $0x190] sm:$0xff] %v317_v50  ;;  %v323_v53 = vld [vmem:[%s1037_s26 + $0x1a08] sm:$0xff]  ;;  %320 = vst [vmem:[%s1042_s27 + $0x198] sm:$0xff] %v319_v51  ;;  %v325_v54 = vld [vmem:[%s1037_s26 + $0x1a10] sm:$0xff] }
  0x2a   : > { %322 = vst [vmem:[%s1042_s27 + $0x1a0] sm:$0xff] %v321_v52  ;;  %324 = vst [vmem:[%s1042_s27 + $0x1a8] sm:$0xff] %v323_v53  ;;  %v327_v55 = vld [vmem:[%s1037_s26 + $0x1a18] sm:$0xff]  ;;  %v329_v56 = vld [vmem:[%s1037_s26 + $0x1c00] sm:$0xff] }
  0x2b   : > { %326 = vst [vmem:[%s1042_s27 + $0x1b0] sm:$0xff] %v325_v54  ;;  %328 = vst [vmem:[%s1042_s27 + $0x1b8] sm:$0xff] %v327_v55  ;;  %v331_v57 = vld [vmem:[%s1037_s26 + $0x1c08] sm:$0xff]  ;;  %v333_v58 = vld [vmem:[%s1037_s26 + $0x1c10] sm:$0xff] }
  0x2c   : > { %330 = vst [vmem:[%s1042_s27 + $0x1c0] sm:$0xff] %v329_v56  ;;  %v335_v59 = vld [vmem:[%s1037_s26 + $0x1c18] sm:$0xff]  ;;  %332 = vst [vmem:[%s1042_s27 + $0x1c8] sm:$0xff] %v331_v57  ;;  %v337_v60 = vld [vmem:[%s1037_s26 + $0x1e00] sm:$0xff] }
  0x2d   : > { %334 = vst [vmem:[%s1042_s27 + $0x1d0] sm:$0xff] %v333_v58  ;;  %336 = vst [vmem:[%s1042_s27 + $0x1d8] sm:$0xff] %v335_v59  ;;  %v339_v61 = vld [vmem:[%s1037_s26 + $0x1e08] sm:$0xff]  ;;  %v341_v62 = vld [vmem:[%s1037_s26 + $0x1e10] sm:$0xff] }
  0x2e   : > { %338 = vst [vmem:[%s1042_s27 + $0x1e0] sm:$0xff] %v337_v60  ;;  %340 = vst [vmem:[%s1042_s27 + $0x1e8] sm:$0xff] %v339_v61  ;;  %v343_v63 = vld [vmem:[%s1037_s26 + $0x1e18] sm:$0xff] }
  0x2f   : > { %342 = vst [vmem:[%s1042_s27 + $0x1f0] sm:$0xff] %v341_v62  ;;  %344 = vst [vmem:[%s1042_s27 + $0x1f8] sm:$0xff] %v343_v63 }
  0x30 PF: > { %p862_p6 = scmp.ge.s32.totalorder %s970_s16, 1  ;;  %p349_p7 = scmp.lt.s32.totalorder %s970_s16, 17 }
  0x32   : > { %p350_p8 = pnand %p862_p6, %p349_p7 }
  0x33   : > { %s356_s28 = sand.u32 (!%p350_p8), 1, %s954_s12   ;;  %s864_s8 = sshll.u32 (!%p350_p8), %s962_s14, 2 }
  0x34   : > { %353 = sbr.rel (%p350_p8) target bundleno = 323 (0x143), region = 51  ;;  %s863_s4 = sshll.u32 (!%p350_p8), %s356_s28, 9 }
  0x35   : > { %s1175_s5 = scalar_lea.vmem (!%p350_p8), [#allocation3], %s863_s4  ;;  %p422_p9 = scmp.lt.s32.totalorder (!%p350_p8), %s864_s8, 63 }
  0x39   : > { %v665_v0 = vld [vmem:[%s1265_s2] sm:$0xff]  ;;  %v972_v1 = vmov 0.0   ;;  %v973_v2 = vmov 0   ;;  %v505_v3 = vld [vmem:[%s1175_s5 + $0x1e8] sm:$0xff]  ;;  %v507_v4 = vld [vmem:[%s1175_s5 + $0x1f8] sm:$0xff]  ;;  %s1274_s8 = smov (!%p422_p9, %s864_s8), 63 }
  0x3a   : > { %572 = vmatprep.mubr.f32.mxu0 %v972_v1  ;;  %643 = vmatprep.mubr.f32.mxu1 %v972_v1  ;;  %v504_v5 = vld [vmem:[%s1175_s5 + $0x1e0] sm:$0xff]  ;;  %v506_v6 = vld [vmem:[%s1175_s5 + $0x1f0] sm:$0xff]  ;;  %v501_v7 = vld [vmem:[%s1175_s5 + $0x1c8] sm:$0xff]  ;;  %s865_s9 = sshll.u32 %s1274_s8, 3 }
  0x3b   : > { %915 = vset.pattern.permute.xlu0 %v973_v2  ;;  %508 = vmatprep.subr.mxu0 %v505_v3  ;;  %v503_v8 = vld [vmem:[%s1175_s5 + $0x1d8] sm:$0xff]  ;;  %v500_v9 = vld [vmem:[%s1175_s5 + $0x1c0] sm:$0xff]  ;;  %v502_v10 = vld [vmem:[%s1175_s5 + $0x1d0] sm:$0xff]  ;;  %s429_s12 = scalar_lea.vmem %s1266_s3, %s865_s9 }
  0x3c   : > { %668 = vperm.xlu0 %915, %v665_v0   ;;  %579 = vmatprep.subr.mxu1 %v507_v4  ;;  %v497_v11 = vld [vmem:[%s1175_s5 + $0x1a8] sm:$0xff]  ;;  %v499_v12 = vld [vmem:[%s1175_s5 + $0x1b8] sm:$0xff]  ;;  %v496_v13 = vld [vmem:[%s1175_s5 + $0x1a0] sm:$0xff] }
  0x3d   : > { %509 = vmatpush1.msra.mxu0 %v504_v5  ;;  %580 = vmatpush1.msra.mxu1 %v506_v6  ;;  %v498_v14 = vld [vmem:[%s1175_s5 + $0x1b0] sm:$0xff]  ;;  %v493_v15 = vld [vmem:[%s1175_s5 + $0x188] sm:$0xff]  ;;  %v495_v16 = vld [vmem:[%s1175_s5 + $0x198] sm:$0xff] }
  0x3e   : > { %510 = vmatprep.subr.mxu0 %v501_v7  ;;  %581 = vmatprep.subr.mxu1 %v503_v8  ;;  %v492_v17 = vld [vmem:[%s1175_s5 + $0x180] sm:$0xff]  ;;  %v494_v18 = vld [vmem:[%s1175_s5 + $0x190] sm:$0xff]  ;;  %v489_v19 = vld [vmem:[%s1175_s5 + $0x168] sm:$0xff] }
  0x3f   : > { %511 = vmatpush1.msra.mxu0 %v500_v9  ;;  %582 = vmatpush1.msra.mxu1 %v502_v10  ;;  %v491_v20 = vld [vmem:[%s1175_s5 + $0x178] sm:$0xff]  ;;  %v488_v21 = vld [vmem:[%s1175_s5 + $0x160] sm:$0xff]  ;;  %v490_v22 = vld [vmem:[%s1175_s5 + $0x170] sm:$0xff] }
  0x40   : > { %512 = vmatprep.subr.mxu0 %v497_v11  ;;  %583 = vmatprep.subr.mxu1 %v499_v12  ;;  %v485_v23 = vld [vmem:[%s1175_s5 + $0x148] sm:$0xff]  ;;  %v487_v24 = vld [vmem:[%s1175_s5 + $0x158] sm:$0xff]  ;;  %v484_v25 = vld [vmem:[%s1175_s5 + $0x140] sm:$0xff] }
  0x41   : > { %513 = vmatpush1.msra.mxu0 %v496_v13  ;;  %584 = vmatpush1.msra.mxu1 %v498_v14  ;;  %v486_v26 = vld [vmem:[%s1175_s5 + $0x150] sm:$0xff]  ;;  %v481_v27 = vld [vmem:[%s1175_s5 + $0x128] sm:$0xff]  ;;  %v483_v28 = vld [vmem:[%s1175_s5 + $0x138] sm:$0xff] }
  0x42   : > { %514 = vmatprep.subr.mxu0 %v493_v15  ;;  %585 = vmatprep.subr.mxu1 %v495_v16  ;;  %v480_v29 = vld [vmem:[%s1175_s5 + $0x120] sm:$0xff]  ;;  %v482_v30 = vld [vmem:[%s1175_s5 + $0x130] sm:$0xff]  ;;  %v477_v31 = vld [vmem:[%s1175_s5 + $0x108] sm:$0xff] }
  0x43   : > { %515 = vmatpush1.msra.mxu0 %v492_v17  ;;  %586 = vmatpush1.msra.mxu1 %v494_v18  ;;  %v479_v32 = vld [vmem:[%s1175_s5 + $0x118] sm:$0xff]  ;;  %v476_v33 = vld [vmem:[%s1175_s5 + $0x100] sm:$0xff]  ;;  %v478_v34 = vld [vmem:[%s1175_s5 + $0x110] sm:$0xff] }
  0x44   : > { %516 = vmatprep.subr.mxu0 %v489_v19  ;;  %587 = vmatprep.subr.mxu1 %v491_v20  ;;  %v473_v35 = vld [vmem:[%s1175_s5 + $0xe8] sm:$0xff]  ;;  %v475_v36 = vld [vmem:[%s1175_s5 + $0xf8] sm:$0xff]  ;;  %v472_v37 = vld [vmem:[%s1175_s5 + $0xe0] sm:$0xff] }
  0x45   : > { %517 = vmatpush1.msra.mxu0 %v488_v21  ;;  %588 = vmatpush1.msra.mxu1 %v490_v22  ;;  %v474_v38 = vld [vmem:[%s1175_s5 + $0xf0] sm:$0xff]  ;;  %v469_v39 = vld [vmem:[%s1175_s5 + $0xc8] sm:$0xff]  ;;  %v471_v40 = vld [vmem:[%s1175_s5 + $0xd8] sm:$0xff] }
  0x46   : > { %518 = vmatprep.subr.mxu0 %v485_v23  ;;  %589 = vmatprep.subr.mxu1 %v487_v24  ;;  %v468_v41 = vld [vmem:[%s1175_s5 + $0xc0] sm:$0xff]  ;;  %v470_v42 = vld [vmem:[%s1175_s5 + $0xd0] sm:$0xff]  ;;  %v465_v43 = vld [vmem:[%s1175_s5 + $0xa8] sm:$0xff] }
  0x47   : > { %519 = vmatpush1.msra.mxu0 %v484_v25  ;;  %590 = vmatpush1.msra.mxu1 %v486_v26  ;;  %v467_v44 = vld [vmem:[%s1175_s5 + $0xb8] sm:$0xff]  ;;  %v464_v45 = vld [vmem:[%s1175_s5 + $0xa0] sm:$0xff]  ;;  %v466_v46 = vld [vmem:[%s1175_s5 + $0xb0] sm:$0xff] }
  0x48   : > { %520 = vmatprep.subr.mxu0 %v481_v27  ;;  %591 = vmatprep.subr.mxu1 %v483_v28  ;;  %v461_v47 = vld [vmem:[%s1175_s5 + $0x88] sm:$0xff]  ;;  %v463_v48 = vld [vmem:[%s1175_s5 + $0x98] sm:$0xff]  ;;  %v460_v49 = vld [vmem:[%s1175_s5 + $0x80] sm:$0xff] }
  0x49   : > { %521 = vmatpush1.msra.mxu0 %v480_v29  ;;  %592 = vmatpush1.msra.mxu1 %v482_v30  ;;  %v462_v50 = vld [vmem:[%s1175_s5 + $0x90] sm:$0xff]  ;;  %v457_v51 = vld [vmem:[%s1175_s5 + $0x68] sm:$0xff]  ;;  %v459_v52 = vld [vmem:[%s1175_s5 + $0x78] sm:$0xff] }
  0x4a   : > { %522 = vmatprep.subr.mxu0 %v477_v31  ;;  %593 = vmatprep.subr.mxu1 %v479_v32  ;;  %v456_v53 = vld [vmem:[%s1175_s5 + $0x60] sm:$0xff]  ;;  %v458_v54 = vld [vmem:[%s1175_s5 + $0x70] sm:$0xff]  ;;  %v453_v55 = vld [vmem:[%s1175_s5 + $0x48] sm:$0xff] }
  0x4b   : > { %523 = vmatpush1.msra.mxu0 %v476_v33  ;;  %594 = vmatpush1.msra.mxu1 %v478_v34  ;;  %v455_v56 = vld [vmem:[%s1175_s5 + $0x58] sm:$0xff]  ;;  %v452_v57 = vld [vmem:[%s1175_s5 + $0x40] sm:$0xff]  ;;  %v454_v58 = vld [vmem:[%s1175_s5 + $0x50] sm:$0xff] }
  0x4c   : > { %524 = vmatprep.subr.mxu0 %v473_v35  ;;  %595 = vmatprep.subr.mxu1 %v475_v36  ;;  %v449_v59 = vld [vmem:[%s1175_s5 + $0x28] sm:$0xff]  ;;  %v451_v60 = vld [vmem:[%s1175_s5 + $0x38] sm:$0xff]  ;;  %v448_v61 = vld [vmem:[%s1175_s5 + $0x20] sm:$0xff] }
  0x4d   : > { %525 = vmatpush1.msra.mxu0 %v472_v37  ;;  %596 = vmatpush1.msra.mxu1 %v474_v38  ;;  %v450_v62 = vld [vmem:[%s1175_s5 + $0x30] sm:$0xff]  ;;  %v445_v63 = vld [vmem:[%s1175_s5 + $0x8] sm:$0xff]  ;;  %v447_v0 = vld [vmem:[%s1175_s5 + $0x18] sm:$0xff] }
  0x4e   : > { %526 = vmatprep.subr.mxu0 %v469_v39  ;;  %597 = vmatprep.subr.mxu1 %v471_v40  ;;  %v444_v1 = vld [vmem:[%s1175_s5] sm:$0xff]  ;;  %v446_v2 = vld [vmem:[%s1175_s5 + $0x10] sm:$0xff] }
  0x4f   : > { %527 = vmatpush1.msra.mxu0 %v468_v41  ;;  %598 = vmatpush1.msra.mxu1 %v470_v42  ;;  %v443_v3 = vld [vmem:[%s1263_s0] sm:$0xff] }
  0x50   : > { %528 = vmatprep.subr.mxu0 %v465_v43  ;;  %599 = vmatprep.subr.mxu1 %v467_v44 }
  0x51   : > { %529 = vmatpush1.msra.mxu0 %v464_v45  ;;  %600 = vmatpush1.msra.mxu1 %v466_v46 }
  0x52   : > { %530 = vmatprep.subr.mxu0 %v461_v47  ;;  %601 = vmatprep.subr.mxu1 %v463_v48 }
  0x53   : > { %531 = vmatpush1.msra.mxu0 %v460_v49  ;;  %602 = vmatpush1.msra.mxu1 %v462_v50 }
  0x54   : > { %532 = vmatprep.subr.mxu0 %v457_v51  ;;  %603 = vmatprep.subr.mxu1 %v459_v52 }
  0x55   : > { %533 = vmatpush1.msra.mxu0 %v456_v53  ;;  %604 = vmatpush1.msra.mxu1 %v458_v54 }
  0x56   : > { %534 = vmatprep.subr.mxu0 %v453_v55  ;;  %605 = vmatprep.subr.mxu1 %v455_v56 }
  0x57   : > { %535 = vmatpush1.msra.mxu0 %v452_v57  ;;  %606 = vmatpush1.msra.mxu1 %v454_v58 }
  0x58   : > { %536 = vmatprep.subr.mxu0 %v449_v59  ;;  %607 = vmatprep.subr.mxu1 %v451_v60 }
  0x59   : > { %537 = vmatpush1.msra.mxu0 %v448_v61  ;;  %608 = vmatpush1.msra.mxu1 %v450_v62 }
  0x5a   : > { %538 = vmatprep.subr.mxu0 %v445_v63  ;;  %609 = vmatprep.subr.mxu1 %v447_v0 }
  0x5b   : > { %539 = vmatpush1.msra.mxu0 %v444_v1  ;;  %610 = vmatpush1.msra.mxu1 %v446_v2 }
  0x5c   : > { %573 = vmatmul.mubr.f32.vlgmr.msra.gmra.mxu0 %v443_v3  ;;  %644 = vmatmul.mubr.f32.vlgmr.msra.gmra.mxu1 %v443_v3 }
  0xb7   : > { %v669_v4 = vpop.permute.xlu0 %668 }
 0x11c   : > { %v574_v5 = vpop.f32.mrf.mxu0  ;;  %v645_v6 = vpop.f32.mrf.mxu1 }
 0x11d   : > { %v671_v7 = vadd.f32 %v669_v4, %v574_v5  ;;  %v673_v8 = vadd.f32 %v669_v4, %v645_v6 }
 0x11e   : > { %v576_v9 = vpop.f32.mrf.mxu0  ;;  %v647_v10 = vpop.f32.mrf.mxu1 }
 0x11f   : > { %v866_v11 = vmul.f32 -1.442695, %v671_v7  ;;  %v868_v12 = vmul.f32 -1.442695, %v673_v8  ;;  %v672_v13 = vadd.f32 %v669_v4, %v576_v9  ;;  %v674_v14 = vadd.f32 %v669_v4, %v647_v10 }
 0x121   : > { %916 = vpow2.f32 %v866_v11  ;;  %v867_v15 = vmul.f32 -1.442695, %v672_v13  ;;  %v869_v16 = vmul.f32 -1.442695, %v674_v14 }
 0x122   : > { %918 = vpow2.f32 %v868_v12 }
 0x123   : > { %920 = vpow2.f32 %v867_v15 }
 0x124   : > { %922 = vpow2.f32 %v869_v16 }
 0x12e   : > { %v917_v17 = vpop.eup %916 }
 0x12f   : > { %v919_v18 = vpop.eup %918  ;;  %v687_v19 = vadd.f32 1.0, %v917_v17 }
 0x130   : > { %v921_v20 = vpop.eup %920  ;;  %v689_v21 = vadd.f32 1.0, %v919_v18 }
 0x131   : > { %v923_v22 = vpop.eup %922  ;;  %924 = vrcp.f32 %v687_v19  ;;  %v688_v23 = vadd.f32 1.0, %v921_v20 }
 0x132   : > { %926 = vrcp.f32 %v689_v21  ;;  %v690_v24 = vadd.f32 1.0, %v923_v22 }
 0x133   : > { %928 = vrcp.f32 %v688_v23 }
 0x134   : > { %930 = vrcp.f32 %v690_v24 }
 0x13e   : > { %v925_v25 = vpop.eup %924 }
 0x13f   : > { %v927_v26 = vpop.eup %926  ;;  %699 = vst [vmem:[%s429_s12] sm:$0xff] %v925_v25 }
 0x140   : > { %v929_v27 = vpop.eup %928  ;;  %701 = vst [vmem:[%s429_s12 + $0x10] sm:$0xff] %v927_v26 }
 0x141   : > { %v931_v28 = vpop.eup %930  ;;  %700 = vst [vmem:[%s429_s12 + $0x8] sm:$0xff] %v929_v27 }
 0x142   : > { %702 = vst [vmem:[%s429_s12 + $0x18] sm:$0xff] %v931_v28 }
 0x143 PF: > { %s13_s16 = sadd.s32 1, %s970_s16   ;;  %s1267_s12 = smov %s958_s13 }
 0x144   : > { %p10_p10 = scmp.ge.s32.totalorder %s13_s16, 18   ;;  %s1268_s13 = smov %s1029_s20 }
 0x145   : > { %s1269_s14 = smov %s966_s15  ;;  %s1270_s15 = smov %s1272_s17 }
 0x146   :  { %12 = sbr.rel (!%p10_p10) target bundleno = 3 (0x3), region = 104 }

</bundles_post_ra>
